<compile_context>
chip_gen: v6e
topology: v6e:2x2x1
jax: 0.10.0
libtpu: 0.0.40
codegen_flags: <defaults>
</compile_context>

<pallas_src>
import functools

import jax
import jax.numpy as jnp
import numpy as np
from jax.experimental import pallas as pl
from jax.experimental.pallas import tpu as pltpu

EPS = 1e-5


# ------------------------------- kernel -------------------------------------
def _bottleneck_kernel(x_ref, w_ref, p_ref, s_ref, o_ref, *, N, H, WC, L):
    """All L = 2*num_blocks (ReflPad + Conv3x3 + IN [+ReLU]) layers, whole batch.

    x_ref: (N, H, WC)        input images, NHWC flattened to (H, W*C)
    w_ref: (L, 3*WC, WC)     banded conv weights (W-refl-pad + 3 H-taps folded)
    p_ref: (WC, WC)          channel-mean broadcast matrix, 1/(H*W) folded in
    s_ref: (2*WC, 2*WC)      permutation: [x | y] pixel-major -> cat(x, y, C)
    o_ref: (N, H, 2*WC)      cat([x, model(x)], channel) in NHWC-flat layout
    """
    cur = [x_ref[n] for n in range(N)]                 # per-image (H, WC) f32
    p = p_ref[...]                                     # (WC, WC)

    for l in range(L):                                 # static unroll: layers
        # ---- build (N*H, 3*WC) conv operand -------------------------------
        # Per image: reflection pad along H, lay the 3 H-tap slabs side by
        # side along lanes so one dot covers all three taps.
        slabs = []
        for n in range(N):
            c = cur[n]
            up = jnp.concatenate([c[1:2], c[:H - 1]], axis=0)       # row h-1
            dn = jnp.concatenate([c[1:H], c[H - 2:H - 1]], axis=0)  # row h+1
            slabs.append(jnp.concatenate([up, c, dn], axis=1))      # (H, 3*WC)
        xcat = jnp.concatenate(slabs, axis=0)                       # (N*H, 3*WC)

        # ---- conv3x3: single lane-dense MXU matmul, K = 3*W*C --------------
        acc = jnp.dot(xcat, w_ref[l],
                      preferred_element_type=jnp.float32)           # (N*H, WC)
        # (bias intentionally omitted: no-op under InstanceNorm(affine=False))

        # ---- instance-norm stats, one small dot for the whole batch --------
        stats = []
        for n in range(N):
            a = acc[n * H:(n + 1) * H]
            stats.append(jnp.sum(a, axis=0, keepdims=True))         # (1, WC)
            stats.append(jnp.sum(a * a, axis=0, keepdims=True))     # (1, WC)
        stats_b = jnp.dot(jnp.concatenate(stats, axis=0), p,
                          preferred_element_type=jnp.float32)       # (2N, WC)

        new_cur = []
        for n in range(N):
            a = acc[n * H:(n + 1) * H]
            mean_b = stats_b[2 * n:2 * n + 1]                       # (1, WC)
            msq_b = stats_b[2 * n + 1:2 * n + 2]                    # (1, WC)
            var_b = jnp.maximum(msq_b - mean_b * mean_b, 0.0)
            y = (a - mean_b) * jax.lax.rsqrt(var_b + EPS)
            if l % 2 == 0:                   # ReLU after 1st conv of a block
                y = jnp.maximum(y, 0.0)
            new_cur.append(y)
        cur = new_cur

    # ---- fold forward()'s channel concat into the kernel output ------------
    xy = jnp.concatenate(
        [jnp.concatenate([x_ref[n], cur[n]], axis=1) for n in range(N)],
        axis=0)                                                     # (N*H, 2*WC)
    out = jnp.dot(xy, s_ref[...], preferred_element_type=jnp.float32)
    for n in range(N):
        o_ref[n] = out[n * H:(n + 1) * H].astype(o_ref.dtype)


def bottleneck_apply(x_flat, w_packed, p_mat, s_mat):
    """x_flat: (N, H, W*C) f32 -> (N, H, W*2C) f32 = cat([x, model(x)], C)."""
    N, H, WC = x_flat.shape
    L = w_packed.shape[0]
    kernel = functools.partial(_bottleneck_kernel, N=N, H=H, WC=WC, L=L)
    # Whole problem (~1.3 MiB) fits in VMEM; single invocation, no grid.
    return pl.pallas_call(
        kernel,
        out_shape=jax.ShapeDtypeStruct((N, H, 2 * WC), jnp.float32),
        in_specs=[pl.BlockSpec(memory_space=pltpu.MemorySpace.VMEM)] * 4,
        out_specs=pl.BlockSpec(memory_space=pltpu.MemorySpace.VMEM),
    )(x_flat, w_packed, p_mat, s_mat)


# --------------------------- parameter packing -------------------------------
def init_bottleneck_params(key, num_blocks, dim):
    """Per block: two (weight (Cout,Cin,3,3), bias (Cout,)) conv layers."""
    params = []
    bound = 1.0 / np.sqrt(dim * 9)       # same scale as PyTorch Conv2d default
    for _ in range(num_blocks):
        layer = []
        for _ in range(2):
            key, kw, kb = jax.random.split(key, 3)
            w = jax.random.uniform(kw, (dim, dim, 3, 3), jnp.float32,
                                   -bound, bound)
            b = jax.random.uniform(kb, (dim,), jnp.float32, -bound, bound)
            layer.append((w, b))
        params.append(tuple(layer))
    return params


def pack_bottleneck_params(params, H, W):
    """One-time host-side packing (call once at setup, not per forward).

    Folds the 3x3 taps, the W-direction reflection padding and the H-tap
    offsets into (L, 3*W*C, W*C) banded weights; biases are dropped on purpose
    (dead under InstanceNorm(affine=False)).
    """
    layers = []
    for (w1, _b1), (w2, _b2) in params:
        layers += [w1, w2]
    L = len(layers)
    C = int(layers[0].shape[0])
    WC = W * C

    def refl(i, n):
        if i < 0:
            return -i
        if i >= n:
            return 2 * n - 2 - i
        return i

    wb = np.zeros((L, 3, WC, WC), np.float32)
    for l, w in enumerate(layers):
        w = np.asarray(w, np.float32)            # (Cout, Cin, 3, 3)
        for dy in range(3):
            for wo in range(W):
                for dx in range(3):
                    wi = refl(wo + dx - 1, W)
                    wb[l, dy, wi * C:(wi + 1) * C, wo * C:(wo + 1) * C] += \
                        w[:, :, dy, dx].T        # (Cin, Cout) block
    w_packed = wb.reshape(L, 3 * WC, WC)         # row index = dy*WC + wi*C + ci

    # channel-mean broadcast with 1/(H*W) folded in
    idx = np.arange(WC)
    p_mat = (idx[:, None] % C == idx[None, :] % C).astype(np.float32) / (H * W)

    # permutation matrix: [x pixels | y pixels] -> per-pixel [x chans, y chans]
    s_mat = np.zeros((2 * WC, 2 * WC), np.float32)
    for wpos in range(W):
        for c in range(C):
            s_mat[wpos * C + c, wpos * 2 * C + c] = 1.0            # x half
            s_mat[WC + wpos * C + c, wpos * 2 * C + C + c] = 1.0   # y half

    return jnp.asarray(w_packed), jnp.asarray(p_mat), jnp.asarray(s_mat)


# ------------------------------- forward -------------------------------------
@jax.jit
def bottleneck_forward(x_nchw, w_packed, p_mat, s_mat):
    """Mirrors BottleNeck.forward: cat([x, model(x)], channel dim), NCHW."""
    N, C, H, W = x_nchw.shape
    x_flat = jnp.transpose(x_nchw, (0, 2, 3, 1)).reshape(N, H, W * C)
    out_flat = bottleneck_apply(x_flat, w_packed, p_mat, s_mat)   # (N,H,W*2C)
    return jnp.transpose(out_flat.reshape(N, H, W, 2 * C), (0, 3, 1, 2))


# ---------------- pure-JAX reference (correctness check) ---------------------
def _ref_step(x_nhwc, w, b, relu):
    xp = jnp.pad(x_nhwc, ((0, 0), (1, 1), (1, 1), (0, 0)), mode="reflect")
    w_hwio = jnp.transpose(w, (2, 3, 1, 0))
    y = jax.lax.conv_general_dilated(
        xp, w_hwio, (1, 1), "VALID",
        dimension_numbers=("NHWC", "HWIO", "NHWC"))
    y = y + b.reshape(1, 1, 1, -1)            # bias kept here (no-op under IN)
    mean = jnp.mean(y, axis=(1, 2), keepdims=True)
    var = jnp.mean((y - mean) ** 2, axis=(1, 2), keepdims=True)
    y = (y - mean) * jax.lax.rsqrt(var + EPS)
    return jnp.maximum(y, 0.0) if relu else y


def _ref_forward(x_nchw, params):
    x_nhwc = jnp.transpose(x_nchw, (0, 2, 3, 1))
    y = x_nhwc
    for (w1, b1), (w2, b2) in params:
        y = _ref_step(y, w1, b1, True)
        y = _ref_step(y, w2, b2, False)
    return jnp.concatenate([x_nchw, jnp.transpose(y, (0, 3, 1, 2))], axis=1)


if __name__ == "__main__":
    N, C, H, W = 2, 8, 16, 16          # batch=2, dim=8, spatial=16 (W*C = 128)
    num_blocks = 2

    key = jax.random.PRNGKey(0)
    kx, kp = jax.random.split(key)
    x = jax.random.normal(kx, (N, C, H, W), jnp.float32)   # NCHW like PyTorch
    params = init_bottleneck_params(kp, num_blocks, C)

    # One-time packing (hoisted out of the forward path).
    w_packed, p_mat, s_mat = pack_bottleneck_params(params, H, W)

    out = jax.block_until_ready(bottleneck_forward(x, w_packed, p_mat, s_mat))
    assert out.shape == (N, 2 * C, H, W), out.shape

    ref = jax.block_until_ready(_ref_forward(x, params))
    np.testing.assert_allclose(np.asarray(out), np.asarray(ref),
                               rtol=2e-4, atol=2e-4)

    print("KERNEL_OK")
</pallas_src>

<mosaic_0001>
module attributes {stable_mosaic.version = 11 : i64} {
  func.func @_bottleneck_kernel(%arg0: memref<2x16x128xf32, #tpu.memory_space<vmem>>, %arg1: memref<4x384x128xf32, #tpu.memory_space<vmem>>, %arg2: memref<128x128xf32, #tpu.memory_space<vmem>>, %arg3: memref<256x256xf32, #tpu.memory_space<vmem>>, %arg4: memref<2x16x256xf32, #tpu.memory_space<vmem>>) attributes {dimension_semantics = [], scalar_prefetch = 0 : i64, scratch_operands = 0 : i64, tpu.core_type = #tpu.core_type<tc>} {
    %c0 = arith.constant 0 : index
    %c0_0 = arith.constant 0 : index
    %c0_1 = arith.constant 0 : index
    %0 = vector.load %arg0[%c0, %c0_0, %c0_1] : memref<2x16x128xf32, #tpu.memory_space<vmem>>, vector<1x16x128xf32>
    %1 = vector.shape_cast %0 : vector<1x16x128xf32> to vector<16x128xf32>
    %c1 = arith.constant 1 : index
    %c0_2 = arith.constant 0 : index
    %c0_3 = arith.constant 0 : index
    %2 = vector.load %arg0[%c1, %c0_2, %c0_3] : memref<2x16x128xf32, #tpu.memory_space<vmem>>, vector<1x16x128xf32>
    %3 = vector.shape_cast %2 : vector<1x16x128xf32> to vector<16x128xf32>
    %c0_4 = arith.constant 0 : index
    %c0_5 = arith.constant 0 : index
    %4 = vector.load %arg2[%c0_4, %c0_5] : memref<128x128xf32, #tpu.memory_space<vmem>>, vector<128x128xf32>
    %5 = vector.extract_strided_slice %1 {offsets = [1, 0], sizes = [1, 128], strides = [1, 1]} : vector<16x128xf32> to vector<1x128xf32>
    %6 = vector.extract_strided_slice %1 {offsets = [0, 0], sizes = [15, 128], strides = [1, 1]} : vector<16x128xf32> to vector<15x128xf32>
    %7 = tpu.concatenate %5, %6 in 0 : vector<1x128xf32>, vector<15x128xf32> -> vector<16x128xf32>
    %8 = vector.extract_strided_slice %1 {offsets = [1, 0], sizes = [15, 128], strides = [1, 1]} : vector<16x128xf32> to vector<15x128xf32>
    %9 = vector.extract_strided_slice %1 {offsets = [14, 0], sizes = [1, 128], strides = [1, 1]} : vector<16x128xf32> to vector<1x128xf32>
    %10 = tpu.concatenate %8, %9 in 0 : vector<15x128xf32>, vector<1x128xf32> -> vector<16x128xf32>
    %11 = tpu.concatenate %7, %1, %10 in 1 : vector<16x128xf32>, vector<16x128xf32>, vector<16x128xf32> -> vector<16x384xf32>
    %12 = vector.extract_strided_slice %3 {offsets = [1, 0], sizes = [1, 128], strides = [1, 1]} : vector<16x128xf32> to vector<1x128xf32>
    %13 = vector.extract_strided_slice %3 {offsets = [0, 0], sizes = [15, 128], strides = [1, 1]} : vector<16x128xf32> to vector<15x128xf32>
    %14 = tpu.concatenate %12, %13 in 0 : vector<1x128xf32>, vector<15x128xf32> -> vector<16x128xf32>
    %15 = vector.extract_strided_slice %3 {offsets = [1, 0], sizes = [15, 128], strides = [1, 1]} : vector<16x128xf32> to vector<15x128xf32>
    %16 = vector.extract_strided_slice %3 {offsets = [14, 0], sizes = [1, 128], strides = [1, 1]} : vector<16x128xf32> to vector<1x128xf32>
    %17 = tpu.concatenate %15, %16 in 0 : vector<15x128xf32>, vector<1x128xf32> -> vector<16x128xf32>
    %18 = tpu.concatenate %14, %3, %17 in 1 : vector<16x128xf32>, vector<16x128xf32>, vector<16x128xf32> -> vector<16x384xf32>
    %19 = tpu.concatenate %11, %18 in 0 : vector<16x384xf32>, vector<16x384xf32> -> vector<32x384xf32>
    %c0_6 = arith.constant 0 : index
    %c0_7 = arith.constant 0 : index
    %c0_8 = arith.constant 0 : index
    %20 = vector.load %arg1[%c0_6, %c0_7, %c0_8] : memref<4x384x128xf32, #tpu.memory_space<vmem>>, vector<1x384x128xf32>
    %21 = vector.shape_cast %20 : vector<1x384x128xf32> to vector<384x128xf32>
    %cst = arith.constant dense<0.000000e+00> : vector<32x128xf32>
    %22 = tpu.matmul %19, %21, %cst {dimension_numbers = #tpu.dot_dimension_numbers<[1], [0], [0], [1], [0, 0, 1, 1], [], []>} : vector<32x384xf32>, vector<384x128xf32>, vector<32x128xf32> -> vector<32x128xf32>
    %23 = vector.extract_strided_slice %22 {offsets = [0, 0], sizes = [16, 128], strides = [1, 1]} : vector<32x128xf32> to vector<16x128xf32>
    %cst_9 = arith.constant dense<0.000000e+00> : vector<128xf32>
    %24 = vector.multi_reduction <add>, %23, %cst_9 [0] : vector<16x128xf32> to vector<128xf32>
    %25 = vector.shape_cast %24 : vector<128xf32> to vector<1x128xf32>
    %26 = arith.mulf %23, %23 : vector<16x128xf32>
    %cst_10 = arith.constant dense<0.000000e+00> : vector<128xf32>
    %27 = vector.multi_reduction <add>, %26, %cst_10 [0] : vector<16x128xf32> to vector<128xf32>
    %28 = vector.shape_cast %27 : vector<128xf32> to vector<1x128xf32>
    %29 = vector.extract_strided_slice %22 {offsets = [16, 0], sizes = [16, 128], strides = [1, 1]} : vector<32x128xf32> to vector<16x128xf32>
    %cst_11 = arith.constant dense<0.000000e+00> : vector<128xf32>
    %30 = vector.multi_reduction <add>, %29, %cst_11 [0] : vector<16x128xf32> to vector<128xf32>
    %31 = vector.shape_cast %30 : vector<128xf32> to vector<1x128xf32>
    %32 = arith.mulf %29, %29 : vector<16x128xf32>
    %cst_12 = arith.constant dense<0.000000e+00> : vector<128xf32>
    %33 = vector.multi_reduction <add>, %32, %cst_12 [0] : vector<16x128xf32> to vector<128xf32>
    %34 = vector.shape_cast %33 : vector<128xf32> to vector<1x128xf32>
    %35 = tpu.concatenate %25, %28, %31, %34 in 0 : vector<1x128xf32>, vector<1x128xf32>, vector<1x128xf32>, vector<1x128xf32> -> vector<4x128xf32>
    %cst_13 = arith.constant dense<0.000000e+00> : vector<4x128xf32>
    %36 = tpu.matmul %35, %4, %cst_13 {dimension_numbers = #tpu.dot_dimension_numbers<[1], [0], [0], [1], [0, 0, 1, 1], [], []>} : vector<4x128xf32>, vector<128x128xf32>, vector<4x128xf32> -> vector<4x128xf32>
    %37 = vector.extract_strided_slice %22 {offsets = [0, 0], sizes = [16, 128], strides = [1, 1]} : vector<32x128xf32> to vector<16x128xf32>
    %38 = vector.extract_strided_slice %36 {offsets = [0, 0], sizes = [1, 128], strides = [1, 1]} : vector<4x128xf32> to vector<1x128xf32>
    %39 = vector.extract_strided_slice %36 {offsets = [1, 0], sizes = [1, 128], strides = [1, 1]} : vector<4x128xf32> to vector<1x128xf32>
    %40 = arith.mulf %38, %38 : vector<1x128xf32>
    %41 = arith.subf %39, %40 : vector<1x128xf32>
    %cst_14 = arith.constant 0.000000e+00 : f32
    %42 = vector.broadcast %cst_14 : f32 to vector<1x128xf32>
    %43 = arith.maximumf %41, %42 : vector<1x128xf32>
    %44 = vector.broadcast %38 : vector<1x128xf32> to vector<16x128xf32>
    %45 = arith.subf %37, %44 : vector<16x128xf32>
    %cst_15 = arith.constant 9.99999974E-6 : f32
    %46 = vector.broadcast %cst_15 : f32 to vector<1x128xf32>
    %47 = arith.addf %43, %46 : vector<1x128xf32>
    %48 = math.rsqrt %47 : vector<1x128xf32>
    %49 = vector.broadcast %48 : vector<1x128xf32> to vector<16x128xf32>
    %50 = arith.mulf %45, %49 : vector<16x128xf32>
    %cst_16 = arith.constant 0.000000e+00 : f32
    %51 = vector.broadcast %cst_16 : f32 to vector<16x128xf32>
    %52 = arith.maximumf %50, %51 : vector<16x128xf32>
    %53 = vector.extract_strided_slice %22 {offsets = [16, 0], sizes = [16, 128], strides = [1, 1]} : vector<32x128xf32> to vector<16x128xf32>
    %54 = vector.extract_strided_slice %36 {offsets = [2, 0], sizes = [1, 128], strides = [1, 1]} : vector<4x128xf32> to vector<1x128xf32>
    %55 = vector.extract_strided_slice %36 {offsets = [3, 0], sizes = [1, 128], strides = [1, 1]} : vector<4x128xf32> to vector<1x128xf32>
    %56 = arith.mulf %54, %54 : vector<1x128xf32>
    %57 = arith.subf %55, %56 : vector<1x128xf32>
    %cst_17 = arith.constant 0.000000e+00 : f32
    %58 = vector.broadcast %cst_17 : f32 to vector<1x128xf32>
    %59 = arith.maximumf %57, %58 : vector<1x128xf32>
    %60 = vector.broadcast %54 : vector<1x128xf32> to vector<16x128xf32>
    %61 = arith.subf %53, %60 : vector<16x128xf32>
    %cst_18 = arith.constant 9.99999974E-6 : f32
    %62 = vector.broadcast %cst_18 : f32 to vector<1x128xf32>
    %63 = arith.addf %59, %62 : vector<1x128xf32>
    %64 = math.rsqrt %63 : vector<1x128xf32>
    %65 = vector.broadcast %64 : vector<1x128xf32> to vector<16x128xf32>
    %66 = arith.mulf %61, %65 : vector<16x128xf32>
    %cst_19 = arith.constant 0.000000e+00 : f32
    %67 = vector.broadcast %cst_19 : f32 to vector<16x128xf32>
    %68 = arith.maximumf %66, %67 : vector<16x128xf32>
    %69 = vector.extract_strided_slice %52 {offsets = [1, 0], sizes = [1, 128], strides = [1, 1]} : vector<16x128xf32> to vector<1x128xf32>
    %70 = vector.extract_strided_slice %52 {offsets = [0, 0], sizes = [15, 128], strides = [1, 1]} : vector<16x128xf32> to vector<15x128xf32>
    %71 = tpu.concatenate %69, %70 in 0 : vector<1x128xf32>, vector<15x128xf32> -> vector<16x128xf32>
    %72 = vector.extract_strided_slice %52 {offsets = [1, 0], sizes = [15, 128], strides = [1, 1]} : vector<16x128xf32> to vector<15x128xf32>
    %73 = vector.extract_strided_slice %52 {offsets = [14, 0], sizes = [1, 128], strides = [1, 1]} : vector<16x128xf32> to vector<1x128xf32>
    %74 = tpu.concatenate %72, %73 in 0 : vector<15x128xf32>, vector<1x128xf32> -> vector<16x128xf32>
    %75 = tpu.concatenate %71, %52, %74 in 1 : vector<16x128xf32>, vector<16x128xf32>, vector<16x128xf32> -> vector<16x384xf32>
    %76 = vector.extract_strided_slice %68 {offsets = [1, 0], sizes = [1, 128], strides = [1, 1]} : vector<16x128xf32> to vector<1x128xf32>
    %77 = vector.extract_strided_slice %68 {offsets = [0, 0], sizes = [15, 128], strides = [1, 1]} : vector<16x128xf32> to vector<15x128xf32>
    %78 = tpu.concatenate %76, %77 in 0 : vector<1x128xf32>, vector<15x128xf32> -> vector<16x128xf32>
    %79 = vector.extract_strided_slice %68 {offsets = [1, 0], sizes = [15, 128], strides = [1, 1]} : vector<16x128xf32> to vector<15x128xf32>
    %80 = vector.extract_strided_slice %68 {offsets = [14, 0], sizes = [1, 128], strides = [1, 1]} : vector<16x128xf32> to vector<1x128xf32>
    %81 = tpu.concatenate %79, %80 in 0 : vector<15x128xf32>, vector<1x128xf32> -> vector<16x128xf32>
    %82 = tpu.concatenate %78, %68, %81 in 1 : vector<16x128xf32>, vector<16x128xf32>, vector<16x128xf32> -> vector<16x384xf32>
    %83 = tpu.concatenate %75, %82 in 0 : vector<16x384xf32>, vector<16x384xf32> -> vector<32x384xf32>
    %c1_20 = arith.constant 1 : index
    %c0_21 = arith.constant 0 : index
    %c0_22 = arith.constant 0 : index
    %84 = vector.load %arg1[%c1_20, %c0_21, %c0_22] : memref<4x384x128xf32, #tpu.memory_space<vmem>>, vector<1x384x128xf32>
    %85 = vector.shape_cast %84 : vector<1x384x128xf32> to vector<384x128xf32>
    %cst_23 = arith.constant dense<0.000000e+00> : vector<32x128xf32>
    %86 = tpu.matmul %83, %85, %cst_23 {dimension_numbers = #tpu.dot_dimension_numbers<[1], [0], [0], [1], [0, 0, 1, 1], [], []>} : vector<32x384xf32>, vector<384x128xf32>, vector<32x128xf32> -> vector<32x128xf32>
    %87 = vector.extract_strided_slice %86 {offsets = [0, 0], sizes = [16, 128], strides = [1, 1]} : vector<32x128xf32> to vector<16x128xf32>
    %cst_24 = arith.constant dense<0.000000e+00> : vector<128xf32>
    %88 = vector.multi_reduction <add>, %87, %cst_24 [0] : vector<16x128xf32> to vector<128xf32>
    %89 = vector.shape_cast %88 : vector<128xf32> to vector<1x128xf32>
    %90 = arith.mulf %87, %87 : vector<16x128xf32>
    %cst_25 = arith.constant dense<0.000000e+00> : vector<128xf32>
    %91 = vector.multi_reduction <add>, %90, %cst_25 [0] : vector<16x128xf32> to vector<128xf32>
    %92 = vector.shape_cast %91 : vector<128xf32> to vector<1x128xf32>
    %93 = vector.extract_strided_slice %86 {offsets = [16, 0], sizes = [16, 128], strides = [1, 1]} : vector<32x128xf32> to vector<16x128xf32>
    %cst_26 = arith.constant dense<0.000000e+00> : vector<128xf32>
    %94 = vector.multi_reduction <add>, %93, %cst_26 [0] : vector<16x128xf32> to vector<128xf32>
    %95 = vector.shape_cast %94 : vector<128xf32> to vector<1x128xf32>
    %96 = arith.mulf %93, %93 : vector<16x128xf32>
    %cst_27 = arith.constant dense<0.000000e+00> : vector<128xf32>
    %97 = vector.multi_reduction <add>, %96, %cst_27 [0] : vector<16x128xf32> to vector<128xf32>
    %98 = vector.shape_cast %97 : vector<128xf32> to vector<1x128xf32>
    %99 = tpu.concatenate %89, %92, %95, %98 in 0 : vector<1x128xf32>, vector<1x128xf32>, vector<1x128xf32>, vector<1x128xf32> -> vector<4x128xf32>
    %cst_28 = arith.constant dense<0.000000e+00> : vector<4x128xf32>
    %100 = tpu.matmul %99, %4, %cst_28 {dimension_numbers = #tpu.dot_dimension_numbers<[1], [0], [0], [1], [0, 0, 1, 1], [], []>} : vector<4x128xf32>, vector<128x128xf32>, vector<4x128xf32> -> vector<4x128xf32>
    %101 = vector.extract_strided_slice %86 {offsets = [0, 0], sizes = [16, 128], strides = [1, 1]} : vector<32x128xf32> to vector<16x128xf32>
    %102 = vector.extract_strided_slice %100 {offsets = [0, 0], sizes = [1, 128], strides = [1, 1]} : vector<4x128xf32> to vector<1x128xf32>
    %103 = vector.extract_strided_slice %100 {offsets = [1, 0], sizes = [1, 128], strides = [1, 1]} : vector<4x128xf32> to vector<1x128xf32>
    %104 = arith.mulf %102, %102 : vector<1x128xf32>
    %105 = arith.subf %103, %104 : vector<1x128xf32>
    %cst_29 = arith.constant 0.000000e+00 : f32
    %106 = vector.broadcast %cst_29 : f32 to vector<1x128xf32>
    %107 = arith.maximumf %105, %106 : vector<1x128xf32>
    %108 = vector.broadcast %102 : vector<1x128xf32> to vector<16x128xf32>
    %109 = arith.subf %101, %108 : vector<16x128xf32>
    %cst_30 = arith.constant 9.99999974E-6 : f32
    %110 = vector.broadcast %cst_30 : f32 to vector<1x128xf32>
    %111 = arith.addf %107, %110 : vector<1x128xf32>
    %112 = math.rsqrt %111 : vector<1x128xf32>
    %113 = vector.broadcast %112 : vector<1x128xf32> to vector<16x128xf32>
    %114 = arith.mulf %109, %113 : vector<16x128xf32>
    %115 = vector.extract_strided_slice %86 {offsets = [16, 0], sizes = [16, 128], strides = [1, 1]} : vector<32x128xf32> to vector<16x128xf32>
    %116 = vector.extract_strided_slice %100 {offsets = [2, 0], sizes = [1, 128], strides = [1, 1]} : vector<4x128xf32> to vector<1x128xf32>
    %117 = vector.extract_strided_slice %100 {offsets = [3, 0], sizes = [1, 128], strides = [1, 1]} : vector<4x128xf32> to vector<1x128xf32>
    %118 = arith.mulf %116, %116 : vector<1x128xf32>
    %119 = arith.subf %117, %118 : vector<1x128xf32>
    %cst_31 = arith.constant 0.000000e+00 : f32
    %120 = vector.broadcast %cst_31 : f32 to vector<1x128xf32>
    %121 = arith.maximumf %119, %120 : vector<1x128xf32>
    %122 = vector.broadcast %116 : vector<1x128xf32> to vector<16x128xf32>
    %123 = arith.subf %115, %122 : vector<16x128xf32>
    %cst_32 = arith.constant 9.99999974E-6 : f32
    %124 = vector.broadcast %cst_32 : f32 to vector<1x128xf32>
    %125 = arith.addf %121, %124 : vector<1x128xf32>
    %126 = math.rsqrt %125 : vector<1x128xf32>
    %127 = vector.broadcast %126 : vector<1x128xf32> to vector<16x128xf32>
    %128 = arith.mulf %123, %127 : vector<16x128xf32>
    %129 = vector.extract_strided_slice %114 {offsets = [1, 0], sizes = [1, 128], strides = [1, 1]} : vector<16x128xf32> to vector<1x128xf32>
    %130 = vector.extract_strided_slice %114 {offsets = [0, 0], sizes = [15, 128], strides = [1, 1]} : vector<16x128xf32> to vector<15x128xf32>
    %131 = tpu.concatenate %129, %130 in 0 : vector<1x128xf32>, vector<15x128xf32> -> vector<16x128xf32>
    %132 = vector.extract_strided_slice %114 {offsets = [1, 0], sizes = [15, 128], strides = [1, 1]} : vector<16x128xf32> to vector<15x128xf32>
    %133 = vector.extract_strided_slice %114 {offsets = [14, 0], sizes = [1, 128], strides = [1, 1]} : vector<16x128xf32> to vector<1x128xf32>
    %134 = tpu.concatenate %132, %133 in 0 : vector<15x128xf32>, vector<1x128xf32> -> vector<16x128xf32>
    %135 = tpu.concatenate %131, %114, %134 in 1 : vector<16x128xf32>, vector<16x128xf32>, vector<16x128xf32> -> vector<16x384xf32>
    %136 = vector.extract_strided_slice %128 {offsets = [1, 0], sizes = [1, 128], strides = [1, 1]} : vector<16x128xf32> to vector<1x128xf32>
    %137 = vector.extract_strided_slice %128 {offsets = [0, 0], sizes = [15, 128], strides = [1, 1]} : vector<16x128xf32> to vector<15x128xf32>
    %138 = tpu.concatenate %136, %137 in 0 : vector<1x128xf32>, vector<15x128xf32> -> vector<16x128xf32>
    %139 = vector.extract_strided_slice %128 {offsets = [1, 0], sizes = [15, 128], strides = [1, 1]} : vector<16x128xf32> to vector<15x128xf32>
    %140 = vector.extract_strided_slice %128 {offsets = [14, 0], sizes = [1, 128], strides = [1, 1]} : vector<16x128xf32> to vector<1x128xf32>
    %141 = tpu.concatenate %139, %140 in 0 : vector<15x128xf32>, vector<1x128xf32> -> vector<16x128xf32>
    %142 = tpu.concatenate %138, %128, %141 in 1 : vector<16x128xf32>, vector<16x128xf32>, vector<16x128xf32> -> vector<16x384xf32>
    %143 = tpu.concatenate %135, %142 in 0 : vector<16x384xf32>, vector<16x384xf32> -> vector<32x384xf32>
    %c2 = arith.constant 2 : index
    %c0_33 = arith.constant 0 : index
    %c0_34 = arith.constant 0 : index
    %144 = vector.load %arg1[%c2, %c0_33, %c0_34] : memref<4x384x128xf32, #tpu.memory_space<vmem>>, vector<1x384x128xf32>
    %145 = vector.shape_cast %144 : vector<1x384x128xf32> to vector<384x128xf32>
    %cst_35 = arith.constant dense<0.000000e+00> : vector<32x128xf32>
    %146 = tpu.matmul %143, %145, %cst_35 {dimension_numbers = #tpu.dot_dimension_numbers<[1], [0], [0], [1], [0, 0, 1, 1], [], []>} : vector<32x384xf32>, vector<384x128xf32>, vector<32x128xf32> -> vector<32x128xf32>
    %147 = vector.extract_strided_slice %146 {offsets = [0, 0], sizes = [16, 128], strides = [1, 1]} : vector<32x128xf32> to vector<16x128xf32>
    %cst_36 = arith.constant dense<0.000000e+00> : vector<128xf32>
    %148 = vector.multi_reduction <add>, %147, %cst_36 [0] : vector<16x128xf32> to vector<128xf32>
    %149 = vector.shape_cast %148 : vector<128xf32> to vector<1x128xf32>
    %150 = arith.mulf %147, %147 : vector<16x128xf32>
    %cst_37 = arith.constant dense<0.000000e+00> : vector<128xf32>
    %151 = vector.multi_reduction <add>, %150, %cst_37 [0] : vector<16x128xf32> to vector<128xf32>
    %152 = vector.shape_cast %151 : vector<128xf32> to vector<1x128xf32>
    %153 = vector.extract_strided_slice %146 {offsets = [16, 0], sizes = [16, 128], strides = [1, 1]} : vector<32x128xf32> to vector<16x128xf32>
    %cst_38 = arith.constant dense<0.000000e+00> : vector<128xf32>
    %154 = vector.multi_reduction <add>, %153, %cst_38 [0] : vector<16x128xf32> to vector<128xf32>
    %155 = vector.shape_cast %154 : vector<128xf32> to vector<1x128xf32>
    %156 = arith.mulf %153, %153 : vector<16x128xf32>
    %cst_39 = arith.constant dense<0.000000e+00> : vector<128xf32>
    %157 = vector.multi_reduction <add>, %156, %cst_39 [0] : vector<16x128xf32> to vector<128xf32>
    %158 = vector.shape_cast %157 : vector<128xf32> to vector<1x128xf32>
    %159 = tpu.concatenate %149, %152, %155, %158 in 0 : vector<1x128xf32>, vector<1x128xf32>, vector<1x128xf32>, vector<1x128xf32> -> vector<4x128xf32>
    %cst_40 = arith.constant dense<0.000000e+00> : vector<4x128xf32>
    %160 = tpu.matmul %159, %4, %cst_40 {dimension_numbers = #tpu.dot_dimension_numbers<[1], [0], [0], [1], [0, 0, 1, 1], [], []>} : vector<4x128xf32>, vector<128x128xf32>, vector<4x128xf32> -> vector<4x128xf32>
    %161 = vector.extract_strided_slice %146 {offsets = [0, 0], sizes = [16, 128], strides = [1, 1]} : vector<32x128xf32> to vector<16x128xf32>
    %162 = vector.extract_strided_slice %160 {offsets = [0, 0], sizes = [1, 128], strides = [1, 1]} : vector<4x128xf32> to vector<1x128xf32>
    %163 = vector.extract_strided_slice %160 {offsets = [1, 0], sizes = [1, 128], strides = [1, 1]} : vector<4x128xf32> to vector<1x128xf32>
    %164 = arith.mulf %162, %162 : vector<1x128xf32>
    %165 = arith.subf %163, %164 : vector<1x128xf32>
    %cst_41 = arith.constant 0.000000e+00 : f32
    %166 = vector.broadcast %cst_41 : f32 to vector<1x128xf32>
    %167 = arith.maximumf %165, %166 : vector<1x128xf32>
    %168 = vector.broadcast %162 : vector<1x128xf32> to vector<16x128xf32>
    %169 = arith.subf %161, %168 : vector<16x128xf32>
    %cst_42 = arith.constant 9.99999974E-6 : f32
    %170 = vector.broadcast %cst_42 : f32 to vector<1x128xf32>
    %171 = arith.addf %167, %170 : vector<1x128xf32>
    %172 = math.rsqrt %171 : vector<1x128xf32>
    %173 = vector.broadcast %172 : vector<1x128xf32> to vector<16x128xf32>
    %174 = arith.mulf %169, %173 : vector<16x128xf32>
    %cst_43 = arith.constant 0.000000e+00 : f32
    %175 = vector.broadcast %cst_43 : f32 to vector<16x128xf32>
    %176 = arith.maximumf %174, %175 : vector<16x128xf32>
    %177 = vector.extract_strided_slice %146 {offsets = [16, 0], sizes = [16, 128], strides = [1, 1]} : vector<32x128xf32> to vector<16x128xf32>
    %178 = vector.extract_strided_slice %160 {offsets = [2, 0], sizes = [1, 128], strides = [1, 1]} : vector<4x128xf32> to vector<1x128xf32>
    %179 = vector.extract_strided_slice %160 {offsets = [3, 0], sizes = [1, 128], strides = [1, 1]} : vector<4x128xf32> to vector<1x128xf32>
    %180 = arith.mulf %178, %178 : vector<1x128xf32>
    %181 = arith.subf %179, %180 : vector<1x128xf32>
    %cst_44 = arith.constant 0.000000e+00 : f32
    %182 = vector.broadcast %cst_44 : f32 to vector<1x128xf32>
    %183 = arith.maximumf %181, %182 : vector<1x128xf32>
    %184 = vector.broadcast %178 : vector<1x128xf32> to vector<16x128xf32>
    %185 = arith.subf %177, %184 : vector<16x128xf32>
    %cst_45 = arith.constant 9.99999974E-6 : f32
    %186 = vector.broadcast %cst_45 : f32 to vector<1x128xf32>
    %187 = arith.addf %183, %186 : vector<1x128xf32>
    %188 = math.rsqrt %187 : vector<1x128xf32>
    %189 = vector.broadcast %188 : vector<1x128xf32> to vector<16x128xf32>
    %190 = arith.mulf %185, %189 : vector<16x128xf32>
    %cst_46 = arith.constant 0.000000e+00 : f32
    %191 = vector.broadcast %cst_46 : f32 to vector<16x128xf32>
    %192 = arith.maximumf %190, %191 : vector<16x128xf32>
    %193 = vector.extract_strided_slice %176 {offsets = [1, 0], sizes = [1, 128], strides = [1, 1]} : vector<16x128xf32> to vector<1x128xf32>
    %194 = vector.extract_strided_slice %176 {offsets = [0, 0], sizes = [15, 128], strides = [1, 1]} : vector<16x128xf32> to vector<15x128xf32>
    %195 = tpu.concatenate %193, %194 in 0 : vector<1x128xf32>, vector<15x128xf32> -> vector<16x128xf32>
    %196 = vector.extract_strided_slice %176 {offsets = [1, 0], sizes = [15, 128], strides = [1, 1]} : vector<16x128xf32> to vector<15x128xf32>
    %197 = vector.extract_strided_slice %176 {offsets = [14, 0], sizes = [1, 128], strides = [1, 1]} : vector<16x128xf32> to vector<1x128xf32>
    %198 = tpu.concatenate %196, %197 in 0 : vector<15x128xf32>, vector<1x128xf32> -> vector<16x128xf32>
    %199 = tpu.concatenate %195, %176, %198 in 1 : vector<16x128xf32>, vector<16x128xf32>, vector<16x128xf32> -> vector<16x384xf32>
    %200 = vector.extract_strided_slice %192 {offsets = [1, 0], sizes = [1, 128], strides = [1, 1]} : vector<16x128xf32> to vector<1x128xf32>
    %201 = vector.extract_strided_slice %192 {offsets = [0, 0], sizes = [15, 128], strides = [1, 1]} : vector<16x128xf32> to vector<15x128xf32>
    %202 = tpu.concatenate %200, %201 in 0 : vector<1x128xf32>, vector<15x128xf32> -> vector<16x128xf32>
    %203 = vector.extract_strided_slice %192 {offsets = [1, 0], sizes = [15, 128], strides = [1, 1]} : vector<16x128xf32> to vector<15x128xf32>
    %204 = vector.extract_strided_slice %192 {offsets = [14, 0], sizes = [1, 128], strides = [1, 1]} : vector<16x128xf32> to vector<1x128xf32>
    %205 = tpu.concatenate %203, %204 in 0 : vector<15x128xf32>, vector<1x128xf32> -> vector<16x128xf32>
    %206 = tpu.concatenate %202, %192, %205 in 1 : vector<16x128xf32>, vector<16x128xf32>, vector<16x128xf32> -> vector<16x384xf32>
    %207 = tpu.concatenate %199, %206 in 0 : vector<16x384xf32>, vector<16x384xf32> -> vector<32x384xf32>
    %c3 = arith.constant 3 : index
    %c0_47 = arith.constant 0 : index
    %c0_48 = arith.constant 0 : index
    %208 = vector.load %arg1[%c3, %c0_47, %c0_48] : memref<4x384x128xf32, #tpu.memory_space<vmem>>, vector<1x384x128xf32>
    %209 = vector.shape_cast %208 : vector<1x384x128xf32> to vector<384x128xf32>
    %cst_49 = arith.constant dense<0.000000e+00> : vector<32x128xf32>
    %210 = tpu.matmul %207, %209, %cst_49 {dimension_numbers = #tpu.dot_dimension_numbers<[1], [0], [0], [1], [0, 0, 1, 1], [], []>} : vector<32x384xf32>, vector<384x128xf32>, vector<32x128xf32> -> vector<32x128xf32>
    %211 = vector.extract_strided_slice %210 {offsets = [0, 0], sizes = [16, 128], strides = [1, 1]} : vector<32x128xf32> to vector<16x128xf32>
    %cst_50 = arith.constant dense<0.000000e+00> : vector<128xf32>
    %212 = vector.multi_reduction <add>, %211, %cst_50 [0] : vector<16x128xf32> to vector<128xf32>
    %213 = vector.shape_cast %212 : vector<128xf32> to vector<1x128xf32>
    %214 = arith.mulf %211, %211 : vector<16x128xf32>
    %cst_51 = arith.constant dense<0.000000e+00> : vector<128xf32>
    %215 = vector.multi_reduction <add>, %214, %cst_51 [0] : vector<16x128xf32> to vector<128xf32>
    %216 = vector.shape_cast %215 : vector<128xf32> to vector<1x128xf32>
    %217 = vector.extract_strided_slice %210 {offsets = [16, 0], sizes = [16, 128], strides = [1, 1]} : vector<32x128xf32> to vector<16x128xf32>
    %cst_52 = arith.constant dense<0.000000e+00> : vector<128xf32>
    %218 = vector.multi_reduction <add>, %217, %cst_52 [0] : vector<16x128xf32> to vector<128xf32>
    %219 = vector.shape_cast %218 : vector<128xf32> to vector<1x128xf32>
    %220 = arith.mulf %217, %217 : vector<16x128xf32>
    %cst_53 = arith.constant dense<0.000000e+00> : vector<128xf32>
    %221 = vector.multi_reduction <add>, %220, %cst_53 [0] : vector<16x128xf32> to vector<128xf32>
    %222 = vector.shape_cast %221 : vector<128xf32> to vector<1x128xf32>
    %223 = tpu.concatenate %213, %216, %219, %222 in 0 : vector<1x128xf32>, vector<1x128xf32>, vector<1x128xf32>, vector<1x128xf32> -> vector<4x128xf32>
    %cst_54 = arith.constant dense<0.000000e+00> : vector<4x128xf32>
    %224 = tpu.matmul %223, %4, %cst_54 {dimension_numbers = #tpu.dot_dimension_numbers<[1], [0], [0], [1], [0, 0, 1, 1], [], []>} : vector<4x128xf32>, vector<128x128xf32>, vector<4x128xf32> -> vector<4x128xf32>
    %225 = vector.extract_strided_slice %210 {offsets = [0, 0], sizes = [16, 128], strides = [1, 1]} : vector<32x128xf32> to vector<16x128xf32>
    %226 = vector.extract_strided_slice %224 {offsets = [0, 0], sizes = [1, 128], strides = [1, 1]} : vector<4x128xf32> to vector<1x128xf32>
    %227 = vector.extract_strided_slice %224 {offsets = [1, 0], sizes = [1, 128], strides = [1, 1]} : vector<4x128xf32> to vector<1x128xf32>
    %228 = arith.mulf %226, %226 : vector<1x128xf32>
    %229 = arith.subf %227, %228 : vector<1x128xf32>
    %cst_55 = arith.constant 0.000000e+00 : f32
    %230 = vector.broadcast %cst_55 : f32 to vector<1x128xf32>
    %231 = arith.maximumf %229, %230 : vector<1x128xf32>
    %232 = vector.broadcast %226 : vector<1x128xf32> to vector<16x128xf32>
    %233 = arith.subf %225, %232 : vector<16x128xf32>
    %cst_56 = arith.constant 9.99999974E-6 : f32
    %234 = vector.broadcast %cst_56 : f32 to vector<1x128xf32>
    %235 = arith.addf %231, %234 : vector<1x128xf32>
    %236 = math.rsqrt %235 : vector<1x128xf32>
    %237 = vector.broadcast %236 : vector<1x128xf32> to vector<16x128xf32>
    %238 = arith.mulf %233, %237 : vector<16x128xf32>
    %239 = vector.extract_strided_slice %210 {offsets = [16, 0], sizes = [16, 128], strides = [1, 1]} : vector<32x128xf32> to vector<16x128xf32>
    %240 = vector.extract_strided_slice %224 {offsets = [2, 0], sizes = [1, 128], strides = [1, 1]} : vector<4x128xf32> to vector<1x128xf32>
    %241 = vector.extract_strided_slice %224 {offsets = [3, 0], sizes = [1, 128], strides = [1, 1]} : vector<4x128xf32> to vector<1x128xf32>
    %242 = arith.mulf %240, %240 : vector<1x128xf32>
    %243 = arith.subf %241, %242 : vector<1x128xf32>
    %cst_57 = arith.constant 0.000000e+00 : f32
    %244 = vector.broadcast %cst_57 : f32 to vector<1x128xf32>
    %245 = arith.maximumf %243, %244 : vector<1x128xf32>
    %246 = vector.broadcast %240 : vector<1x128xf32> to vector<16x128xf32>
    %247 = arith.subf %239, %246 : vector<16x128xf32>
    %cst_58 = arith.constant 9.99999974E-6 : f32
    %248 = vector.broadcast %cst_58 : f32 to vector<1x128xf32>
    %249 = arith.addf %245, %248 : vector<1x128xf32>
    %250 = math.rsqrt %249 : vector<1x128xf32>
    %251 = vector.broadcast %250 : vector<1x128xf32> to vector<16x128xf32>
    %252 = arith.mulf %247, %251 : vector<16x128xf32>
    %c0_59 = arith.constant 0 : index
    %c0_60 = arith.constant 0 : index
    %c0_61 = arith.constant 0 : index
    %253 = vector.load %arg0[%c0_59, %c0_60, %c0_61] : memref<2x16x128xf32, #tpu.memory_space<vmem>>, vector<1x16x128xf32>
    %254 = vector.shape_cast %253 : vector<1x16x128xf32> to vector<16x128xf32>
    %255 = tpu.concatenate %254, %238 in 1 : vector<16x128xf32>, vector<16x128xf32> -> vector<16x256xf32>
    %c1_62 = arith.constant 1 : index
    %c0_63 = arith.constant 0 : index
    %c0_64 = arith.constant 0 : index
    %256 = vector.load %arg0[%c1_62, %c0_63, %c0_64] : memref<2x16x128xf32, #tpu.memory_space<vmem>>, vector<1x16x128xf32>
    %257 = vector.shape_cast %256 : vector<1x16x128xf32> to vector<16x128xf32>
    %258 = tpu.concatenate %257, %252 in 1 : vector<16x128xf32>, vector<16x128xf32> -> vector<16x256xf32>
    %259 = tpu.concatenate %255, %258 in 0 : vector<16x256xf32>, vector<16x256xf32> -> vector<32x256xf32>
    %c0_65 = arith.constant 0 : index
    %c0_66 = arith.constant 0 : index
    %260 = vector.load %arg3[%c0_65, %c0_66] : memref<256x256xf32, #tpu.memory_space<vmem>>, vector<256x256xf32>
    %cst_67 = arith.constant dense<0.000000e+00> : vector<32x256xf32>
    %261 = tpu.matmul %259, %260, %cst_67 {dimension_numbers = #tpu.dot_dimension_numbers<[1], [0], [0], [1], [0, 0, 1, 1], [], []>} : vector<32x256xf32>, vector<256x256xf32>, vector<32x256xf32> -> vector<32x256xf32>
    %262 = vector.extract_strided_slice %261 {offsets = [0, 0], sizes = [16, 256], strides = [1, 1]} : vector<32x256xf32> to vector<16x256xf32>
    %c0_68 = arith.constant 0 : index
    %c0_69 = arith.constant 0 : index
    %c0_70 = arith.constant 0 : index
    %263 = vector.load %arg4[%c0_68, %c0_69, %c0_70] : memref<2x16x256xf32, #tpu.memory_space<vmem>>, vector<1x16x256xf32>
    %264 = vector.shape_cast %263 : vector<1x16x256xf32> to vector<16x256xf32>
    %265 = vector.shape_cast %262 : vector<16x256xf32> to vector<1x16x256xf32>
    tpu.vector_store %arg4[%c0_68, %c0_69, %c0_70], %265 {strides = array<i32>} : memref<2x16x256xf32, #tpu.memory_space<vmem>>, vector<1x16x256xf32>,
    %266 = vector.extract_strided_slice %261 {offsets = [16, 0], sizes = [16, 256], strides = [1, 1]} : vector<32x256xf32> to vector<16x256xf32>
    %c1_71 = arith.constant 1 : index
    %c0_72 = arith.constant 0 : index
    %c0_73 = arith.constant 0 : index
    %267 = vector.load %arg4[%c1_71, %c0_72, %c0_73] : memref<2x16x256xf32, #tpu.memory_space<vmem>>, vector<1x16x256xf32>
    %268 = vector.shape_cast %267 : vector<1x16x256xf32> to vector<16x256xf32>
    %269 = vector.shape_cast %266 : vector<16x256xf32> to vector<1x16x256xf32>
    tpu.vector_store %arg4[%c1_71, %c0_72, %c0_73], %269 {strides = array<i32>} : memref<2x16x256xf32, #tpu.memory_space<vmem>>, vector<1x16x256xf32>,
    return
  }
}

</mosaic_0001>

<bundles_post_ra>
// kernel: bottleneck_forward.1
= control target key start
LH: loop header
LB: loop body
LE: loop exit
PB: predicated region body
PF: predicated region fallthrough
CT: control target
= control target key end

     0   :  { %9 = vsyncpa [#allocation3], 0  ;;  %s2459_s15 = smov [#allocation2]   ;;  %s3211_s0 = inlined_call_operand.vmem [shape: f32[2,16,128], index: 0, kind: input, shape index: {}]   ;;  %s3212_s1 = inlined_call_operand.hbm [shape: f32[4,384,128], index: 1, kind: input, shape index: {}]   ;;  %s3213_s2 = inlined_call_operand.vmem [shape: f32[128,128], index: 2, kind: input, shape index: {}]   ;;  %s3214_s3 = inlined_call_operand.vmem [shape: f32[256,256], index: 3, kind: input, shape index: {}]   ;;  %s3215_s4 = inlined_call_operand.vmem [shape: f32[2,16,256], index: 4, kind: output, shape index: {}]  }
   0x1   :  { %s17_s16 = sshll.u32 %s2459_s15, 4  ;;  %s18_s16 = int_to_ptr.vmem [resolvable:$true] %s17_s16 }
   0x2   :  { %s2445_s17 = scalar_lea.vmem %s18_s16, 24576  ;;  %p2450_p1 = scmp.lt.s32.totalorder %s18_s16, %s18_s16 }
   0x3   :  { %p2446_p0 = scmp.ne.s32.totalorder %s18_s16, %s2445_s17  ;;  %p2451_p2 = scmp.lt.s32.totalorder %s2445_s17, %s2445_s17 }
   0x5   :  { %p2452_p3 = por %p2451_p2, %p2450_p1 }
   0x7   :  { %p2453_p4 = pnand %p2452_p3, %p2446_p0 }
   0x9   :  { %2456 = shalt.err (!%p2453_p4)
}
   0xa   :  { %s2460_s18 = smov 128   ;;  %s2461_s19 = smov 8  }
   0xb   :  { %23 = dma.hbm_to_vmem [thread:$0]  %s3212_s1, 24576, %s18_s16, [#allocation3], %s2460_s18, %s2460_s18, %s2461_s19  }
   0xc   :  { %2457 = dma.done.wait [#allocation3], 24576  }
   0xd   :  { %2458 = vsyncadd [#allocation3], 4294942720  ;;  %v117_v0 = vld [vmem:[#allocation2 + $0xf8] sm:$0xff]  ;;  %v116_v2 = vld [vmem:[#allocation2 + $0xf0] sm:$0xff]  ;;  %vm56_vm0 = vcmask 1040384   ;;  %vm63_vm1 = vcmask 1046528  }
   0xe   :  { %v101_v1 = vld [vmem:[#allocation2 + $0x78] sm:$0xff]  ;;  %1788 = vmatprep.subr.mxu1 %v117_v0  ;;  %v100_v3 = vld [vmem:[#allocation2 + $0x70] sm:$0xff]  ;;  %v115_v4 = vld [vmem:[#allocation2 + $0xe8] sm:$0xff]  ;;  %vm2463_vm2 = vmmov 0   ;;  %vm337_vm3 = vcmask 1041408   ;;  %vm339_vm4 = vcmask 1042432  }
   0xf   :  { %1789 = vmatpush3.msra.mxu1 %v101_v1  ;;  %v99_v5 = vld [vmem:[#allocation2 + $0x68] sm:$0xff]  ;;  %v114_v6 = vld [vmem:[#allocation2 + $0xe0] sm:$0xff]  ;;  %v113_v8 = vld [vmem:[#allocation2 + $0xd8] sm:$0xff] }
  0x10   :  { %1790 = vmatprep.subr.mxu1 %v116_v2  ;;  %v98_v7 = vld [vmem:[#allocation2 + $0x60] sm:$0xff]  ;;  %v97_v9 = vld [vmem:[#allocation2 + $0x58] sm:$0xff]  ;;  %v112_v10 = vld [vmem:[#allocation2 + $0xd0] sm:$0xff] }
  0x11   :  { %1791 = vmatpush3.msra.mxu1 %v100_v3  ;;  %v96_v11 = vld [vmem:[#allocation2 + $0x50] sm:$0xff]  ;;  %v111_v12 = vld [vmem:[#allocation2 + $0xc8] sm:$0xff]  ;;  %v2495_v13 = vld [vmem:[%s3211_s0] sm:$0xff] }
  0x12   :  { %1792 = vmatprep.subr.mxu1 %v115_v4  ;;  %v95_v14 = vld [vmem:[#allocation2 + $0x48] sm:$0xff]  ;;  %198 = vmatprep.mubr.f32.mxu1 %v2495_v13  ;;  %v110_v15 = vld [vmem:[#allocation2 + $0xc0] sm:$0xff]  ;;  %v109_v17 = vld [vmem:[#allocation2 + $0xb8] sm:$0xff]  ;;  %v53_v30 = vrot.slane %v2495_v13, 1  ;;  %v57_v31 = vrot.slane %v2495_v13, 7 }
  0x13   :  { %1793 = vmatpush3.msra.mxu1 %v99_v5  ;;  %v94_v16 = vld [vmem:[#allocation2 + $0x40] sm:$0xff]  ;;  %v93_v18 = vld [vmem:[#allocation2 + $0x38] sm:$0xff]  ;;  %v108_v19 = vld [vmem:[#allocation2 + $0xb0] sm:$0xff]  ;;  %v2462_v5 = vmov 0.0  }
  0x14   :  { %1794 = vmatprep.subr.mxu1 %v114_v6  ;;  %v92_v20 = vld [vmem:[#allocation2 + $0x30] sm:$0xff]  ;;  %v107_v21 = vld [vmem:[#allocation2 + $0xa8] sm:$0xff]  ;;  %v106_v23 = vld [vmem:[#allocation2 + $0xa0] sm:$0xff]  ;;  %v62_v36 = vsel %vm56_vm0, %v53_v30, %v57_v31  ;;  %2150 = vmatprep.subr.mxu0 %v2462_v5 }
  0x15   :  { %1795 = vmatpush3.msra.mxu1 %v98_v7  ;;  %v91_v22 = vld [vmem:[#allocation2 + $0x28] sm:$0xff]  ;;  %v90_v24 = vld [vmem:[#allocation2 + $0x20] sm:$0xff]  ;;  %v105_v25 = vld [vmem:[#allocation2 + $0x98] sm:$0xff]  ;;  %2182 = vmatprep.mubr.msk.f32.mxu0 %vm2463_vm2, %v2462_v5 }
  0x16   :  { %1796 = vmatprep.subr.mxu1 %v113_v8  ;;  %v89_v26 = vld [vmem:[#allocation2 + $0x18] sm:$0xff]  ;;  %v104_v27 = vld [vmem:[#allocation2 + $0x90] sm:$0xff]  ;;  %v103_v29 = vld [vmem:[#allocation2 + $0x88] sm:$0xff] }
  0x17   :  { %1797 = vmatpush3.msra.mxu1 %v97_v9  ;;  %v88_v28 = vld [vmem:[#allocation2 + $0x10] sm:$0xff]  ;;  %v87_v32 = vld [vmem:[#allocation2 + $0x8] sm:$0xff]  ;;  %v102_v34 = vld [vmem:[#allocation2 + $0x80] sm:$0xff] }
  0x18   :  { %1798 = vmatprep.subr.mxu1 %v112_v10  ;;  %v2503_v33 = vld [vmem:[%s3211_s0 + $0x8] sm:$0xff]  ;;  %v86_v35 = vld [vmem:[#allocation2] sm:$0xff]  ;;  %v133_v37 = vld [vmem:[#allocation2 + $0x178] sm:$0xff] }
  0x19   :  { %1799 = vmatpush3.msra.mxu1 %v96_v11  ;;  %v58_v38 = vrot.slane %v2503_v33, 7  ;;  %v2510_v39 = vld [vmem:[%s3211_s0 + $0x10] sm:$0xff]  ;;  %v131_v41 = vld [vmem:[#allocation2 + $0x168] sm:$0xff]  ;;  %v1783_v45 = vld [vmem:[%s3211_s0 + $0x18] sm:$0xff]  ;;  %v64_v50 = vrot.slane %v2503_v33, 1 }
  0x1a   :  { %1800 = vmatprep.subr.mxu1 %v111_v12  ;;  %v132_v40 = vld [vmem:[#allocation2 + $0x170] sm:$0xff]  ;;  %v71_v43 = vrot.slane %v2510_v39, 1  ;;  %v74_v44 = vrot.slane %v2510_v39, 7  ;;  %v130_v46 = vld [vmem:[#allocation2 + $0x160] sm:$0xff]  ;;  %v129_v47 = vld [vmem:[#allocation2 + $0x158] sm:$0xff]  ;;  %v75_v49 = vrot.slane %v1783_v45, 7 }
  0x1b   :  { %1801 = vmatpush3.msra.mxu1 %v95_v14  ;;  %v59_v42 = vsel %vm56_vm0, %v57_v31, %v58_v38  ;;  %v128_v51 = vld [vmem:[#allocation2 + $0x150] sm:$0xff]  ;;  %v127_v52 = vld [vmem:[#allocation2 + $0x148] sm:$0xff]  ;;  %v65_v54 = vsel %vm63_vm1, %v53_v30, %v64_v50  ;;  %v126_v55 = vld [vmem:[#allocation2 + $0x140] sm:$0xff]  ;;  %v80_v63 = vrot.slane %v1783_v45, 1  ;;  %v69_v1 = vsel %vm63_vm1, %v64_v50, %v58_v38 }
  0x1c   :  { %1802 = vmatprep.subr.mxu1 %v110_v15  ;;  %v79_v48 = vsel %vm56_vm0, %v71_v43, %v74_v44  ;;  %v76_v53 = vsel %vm56_vm0, %v74_v44, %v75_v49  ;;  %v125_v56 = vld [vmem:[#allocation2 + $0x138] sm:$0xff]  ;;  %v124_v57 = vld [vmem:[#allocation2 + $0x130] sm:$0xff]  ;;  %v123_v58 = vld [vmem:[#allocation2 + $0x128] sm:$0xff] }
  0x1d   :  { %1803 = vmatpush3.msra.mxu1 %v94_v16  ;;  %v122_v59 = vld [vmem:[#allocation2 + $0x120] sm:$0xff]  ;;  %v121_v60 = vld [vmem:[#allocation2 + $0x118] sm:$0xff]  ;;  %v120_v61 = vld [vmem:[#allocation2 + $0x110] sm:$0xff]  ;;  %v81_v2 = vsel %vm63_vm1, %v71_v43, %v80_v63  ;;  %v85_v3 = vsel %vm63_vm1, %v80_v63, %v75_v49 }
  0x1e   :  { %1804 = vmatprep.subr.mxu1 %v109_v17  ;;  %v119_v62 = vld [vmem:[#allocation2 + $0x108] sm:$0xff]  ;;  %v118_v0 = vld [vmem:[#allocation2 + $0x100] sm:$0xff]  ;;  %v2534_v4 = vld [vmem:[%s3213_s2 + $0x78] sm:$0xff] }
  0x1f   :  { %1805 = vmatpush3.msra.mxu1 %v93_v18  ;;  %2151 = vmatpush3.msra.mxu0 %v2534_v4  ;;  %v2542_v6 = vld [vmem:[%s3213_s2 + $0x70] sm:$0xff]  ;;  %v2547_v7 = vld [vmem:[%s3213_s2 + $0x68] sm:$0xff]  ;;  %v2556_v8 = vld [vmem:[%s3213_s2 + $0x60] sm:$0xff] }
  0x20   :  { %1806 = vmatprep.subr.mxu1 %v108_v19  ;;  %2152 = vmatprep.subr.mxu0 %v2462_v5  ;;  %v2563_v9 = vld [vmem:[%s3213_s2 + $0x58] sm:$0xff]  ;;  %v2570_v10 = vld [vmem:[%s3213_s2 + $0x50] sm:$0xff]  ;;  %v2577_v11 = vld [vmem:[%s3213_s2 + $0x48] sm:$0xff] }
  0x21   :  { %1807 = vmatpush3.msra.mxu1 %v92_v20  ;;  %2153 = vmatpush3.msra.mxu0 %v2542_v6  ;;  %v2584_v12 = vld [vmem:[%s3213_s2 + $0x40] sm:$0xff]  ;;  %v2591_v13 = vld [vmem:[%s3213_s2 + $0x38] sm:$0xff]  ;;  %v2598_v14 = vld [vmem:[%s3213_s2 + $0x30] sm:$0xff] }
  0x22   :  { %1808 = vmatprep.subr.mxu1 %v107_v21  ;;  %2154 = vmatprep.subr.mxu0 %v2462_v5  ;;  %v2605_v15 = vld [vmem:[%s3213_s2 + $0x28] sm:$0xff]  ;;  %v2612_v16 = vld [vmem:[%s3213_s2 + $0x20] sm:$0xff]  ;;  %v2618_v17 = vld [vmem:[%s3213_s2 + $0x18] sm:$0xff] }
  0x23   :  { %1809 = vmatpush3.msra.mxu1 %v91_v22  ;;  %2155 = vmatpush3.msra.mxu0 %v2547_v7  ;;  %v2624_v18 = vld [vmem:[%s3213_s2 + $0x10] sm:$0xff]  ;;  %v2633_v19 = vld [vmem:[%s3213_s2 + $0x8] sm:$0xff]  ;;  %v2640_v20 = vld [vmem:[%s3213_s2] sm:$0xff] }
  0x24   :  { %1810 = vmatprep.subr.mxu1 %v106_v23  ;;  %2156 = vmatprep.subr.mxu0 %v2462_v5 }
  0x25   :  { %1811 = vmatpush3.msra.mxu1 %v90_v24  ;;  %2157 = vmatpush3.msra.mxu0 %v2556_v8 }
  0x26   :  { %1812 = vmatprep.subr.mxu1 %v105_v25  ;;  %2158 = vmatprep.subr.mxu0 %v2462_v5 }
  0x27   :  { %1813 = vmatpush3.msra.mxu1 %v89_v26  ;;  %2159 = vmatpush3.msra.mxu0 %v2563_v9 }
  0x28   :  { %1814 = vmatprep.subr.mxu1 %v104_v27  ;;  %2160 = vmatprep.subr.mxu0 %v2462_v5 }
  0x29   :  { %1815 = vmatpush3.msra.mxu1 %v88_v28  ;;  %2161 = vmatpush3.msra.mxu0 %v2570_v10 }
  0x2a   :  { %1816 = vmatprep.subr.mxu1 %v103_v29  ;;  %2162 = vmatprep.subr.mxu0 %v2462_v5 }
  0x2b   :  { %1817 = vmatpush3.msra.mxu1 %v87_v32  ;;  %2163 = vmatpush3.msra.mxu0 %v2577_v11 }
  0x2c   :  { %1818 = vmatprep.subr.mxu1 %v102_v34  ;;  %2164 = vmatprep.subr.mxu0 %v2462_v5 }
  0x2d   :  { %1819 = vmatpush3.msra.mxu1 %v86_v35  ;;  %2165 = vmatpush3.msra.mxu0 %v2584_v12 }
  0x2e   :  { %199 = vmatmul.mubr.f32.vlgmr.msra.gmra.mxu1 %v62_v36  ;;  %2112 = vmatprep.subr.mxu1 %v133_v37 }
  0x2f   :  { %2113 = vmatpush3.msra.mxu1 %v133_v37  ;;  %203 = vmatprep.mubr.f32.mxu1 %v2503_v33 }
  0x30   :  { %2114 = vmatprep.subr.mxu1 %v132_v40  ;;  %2166 = vmatprep.subr.mxu0 %v2462_v5 }
  0x31   :  { %2115 = vmatpush3.msra.mxu1 %v132_v40  ;;  %2167 = vmatpush3.msra.mxu0 %v2591_v13 }
  0x32   :  { %2116 = vmatprep.subr.mxu1 %v131_v41  ;;  %204 = vmatmul.mubr.f32.gmra.mxu1 %v59_v42 }
  0x33   :  { %2117 = vmatpush3.msra.mxu1 %v131_v41  ;;  %208 = vmatprep.mubr.f32.mxu1 %v2510_v39 }
  0x34   :  { %2118 = vmatprep.subr.mxu1 %v130_v46  ;;  %2168 = vmatprep.subr.mxu0 %v2462_v5 }
  0x35   :  { %2119 = vmatpush3.msra.mxu1 %v130_v46  ;;  %2169 = vmatpush3.msra.mxu0 %v2598_v14 }
  0x36   :  { %2120 = vmatprep.subr.mxu1 %v129_v47  ;;  %209 = vmatmul.mubr.f32.gmra.mxu1 %v79_v48 }
  0x37   :  { %2121 = vmatpush3.msra.mxu1 %v129_v47  ;;  %213 = vmatprep.mubr.f32.mxu1 %v1783_v45 }
  0x38   :  { %2122 = vmatprep.subr.mxu1 %v128_v51  ;;  %2170 = vmatprep.subr.mxu0 %v2462_v5 }
  0x39   :  { %2123 = vmatpush3.msra.mxu1 %v128_v51  ;;  %2171 = vmatpush3.msra.mxu0 %v2605_v15 }
  0x3a   :  { %2124 = vmatprep.subr.mxu1 %v127_v52  ;;  %214 = vmatmul.mubr.f32.gmra.mxu1 %v76_v53 }
  0x3b   :  { %2125 = vmatpush3.msra.mxu1 %v127_v52  ;;  %2144 = vmatprep.mubr.f32.mxu1 %v65_v54 }
  0x3c   :  { %2126 = vmatprep.subr.mxu1 %v126_v55  ;;  %2172 = vmatprep.subr.mxu0 %v2462_v5 }
  0x3d   :  { %2127 = vmatpush3.msra.mxu1 %v126_v55  ;;  %2173 = vmatpush3.msra.mxu0 %v2612_v16 }
  0x3e   :  { %2128 = vmatprep.subr.mxu1 %v125_v56  ;;  %2174 = vmatprep.subr.mxu0 %v2462_v5 }
  0x3f   :  { %2129 = vmatpush3.msra.mxu1 %v125_v56  ;;  %2175 = vmatpush3.msra.mxu0 %v2618_v17 }
  0x40   :  { %2130 = vmatprep.subr.mxu1 %v124_v57  ;;  %2176 = vmatprep.subr.mxu0 %v2462_v5 }
  0x41   :  { %2131 = vmatpush3.msra.mxu1 %v124_v57  ;;  %2177 = vmatpush3.msra.mxu0 %v2624_v18 }
  0x42   :  { %2132 = vmatprep.subr.mxu1 %v123_v58  ;;  %2178 = vmatprep.subr.mxu0 %v2462_v5 }
  0x43   :  { %2133 = vmatpush3.msra.mxu1 %v123_v58  ;;  %2179 = vmatpush3.msra.mxu0 %v2633_v19 }
  0x44   :  { %2134 = vmatprep.subr.mxu1 %v122_v59  ;;  %2180 = vmatprep.subr.mxu0 %v2462_v5 }
  0x45   :  { %2135 = vmatpush3.msra.mxu1 %v122_v59  ;;  %2181 = vmatpush3.msra.mxu0 %v2640_v20 }
  0x46   :  { %2136 = vmatprep.subr.mxu1 %v121_v60 }
  0x47   :  { %2137 = vmatpush3.msra.mxu1 %v121_v60 }
  0x48   :  { %2138 = vmatprep.subr.mxu1 %v120_v61 }
  0x49   :  { %2139 = vmatpush3.msra.mxu1 %v120_v61 }
  0x4a   :  { %2140 = vmatprep.subr.mxu1 %v119_v62 }
  0x4b   :  { %2141 = vmatpush3.msra.mxu1 %v119_v62 }
  0x4c   :  { %2142 = vmatprep.subr.mxu1 %v118_v0 }
  0x4d   :  { %2143 = vmatpush3.msra.mxu1 %v118_v0 }
  0x4e   :  { %2145 = vmatmul.mubr.f32.vlgmr.msra.gmra.mxu1 %v69_v1 }
  0x4f   :  { %2147 = vmatprep.mubr.f32.mxu1 %v81_v2 }
  0x52   :  { %2148 = vmatmul.mubr.f32.gmra.mxu1 %v85_v3 }
  0xee   :  { %v1820_v21 = vpop.f32.mrf.mxu1 }
  0xf0   :  { %v1821_v22 = vpop.f32.mrf.mxu1 }
  0xf1   :  { %v1822_v31 = vadd.f32 %v1821_v22, %v1820_v21 }
  0xf2   :  { %v1823_v23 = vpop.f32.mrf.mxu1 }
  0xf4   :  { %v1824_v24 = vpop.f32.mrf.mxu1 }
  0xf5   :  { %v1825_v29 = vadd.f32 %v1824_v24, %v1823_v23 }
  0xf6   :  { %v1826_v25 = vpop.f32.mrf.mxu1 }
  0xf8   :  { %v1827_v26 = vpop.f32.mrf.mxu1 }
  0xf9   :  { %v1828_v36 = vadd.f32 %v1827_v26, %v1826_v25 }
  0xfa   :  { %v1829_v27 = vpop.f32.mrf.mxu1 }
  0xfc   :  { %v1830_v28 = vpop.f32.mrf.mxu1 }
  0xfd   :  { %v1831_v34 = vadd.f32 %v1830_v28, %v1829_v27 }
 0x10e   :  { %v2146_v30 = vpop.f32.mrf.mxu1 }
 0x10f   :  { %v2645_v32 = vadd.f32 %v2146_v30, %v1825_v29  ;;  %v511_v29 = vld [vmem:[#allocation2 + $0x278] sm:$0xff] }
 0x110   :  { %v285_v33 = vpop.f32.mrf.mxu1  ;;  %1869 = vmatprep.subr.mxu1 %v511_v29  ;;  %v495_v30 = vld [vmem:[#allocation2 + $0x1f8] sm:$0xff]  ;;  %v481_v29 = vld [vmem:[#allocation2 + $0x188] sm:$0xff] }
 0x111   :  { %v2647_v35 = vadd.f32 %v1822_v31, %v285_v33  ;;  %v312_v38 = vmul.f32 %v2645_v32, %v2645_v32  ;;  %v527_v31 = vld [vmem:[#allocation2 + $0x2f8] sm:$0xff]  ;;  %1870 = vmatpush3.msra.mxu1 %v495_v30  ;;  %v510_v33 = vld [vmem:[#allocation2 + $0x270] sm:$0xff]  ;;  %v513_v30 = vld [vmem:[#allocation2 + $0x288] sm:$0xff] }
 0x112   :  { %v2149_v37 = vpop.f32.mrf.mxu1  ;;  %2185 = vmatprep.subr.mxu0 %v527_v31  ;;  %1871 = vmatprep.subr.mxu1 %v510_v33  ;;  %v480_v33 = vld [vmem:[#allocation2 + $0x180] sm:$0xff] }
 0x113   :  { %v304_v39 = vadd.f32 %v2645_v32, %v2647_v35  ;;  %v311_v40 = vmul.f32 %v2647_v35, %v2647_v35  ;;  %v2655_v41 = vadd.f32 %v2149_v37, %v1831_v34  ;;  %v494_v34 = vld [vmem:[#allocation2 + $0x1f0] sm:$0xff]  ;;  %v509_v37 = vld [vmem:[#allocation2 + $0x268] sm:$0xff] }
 0x114   :  { %v295_v42 = vpop.f32.mrf.mxu1  ;;  %1872 = vmatpush3.msra.mxu1 %v494_v34  ;;  %v512_v34 = vld [vmem:[#allocation2 + $0x280] sm:$0xff] }
 0x115   :  { %v305_v43 = vrot.slane %v304_v39, 4  ;;  %v313_v44 = vadd.f32 %v312_v38, %v311_v40  ;;  %v2657_v45 = vadd.f32 %v1828_v36, %v295_v42  ;;  %v328_v46 = vmul.f32 %v2655_v41, %v2655_v41  ;;  %v526_v36 = vld [vmem:[#allocation2 + $0x2f0] sm:$0xff]  ;;  %1873 = vmatprep.subr.mxu1 %v509_v37  ;;  %v493_v38 = vld [vmem:[#allocation2 + $0x1e8] sm:$0xff]  ;;  %v508_v40 = vld [vmem:[#allocation2 + $0x260] sm:$0xff] }
 0x116   :  { %1874 = vmatpush3.msra.mxu1 %v493_v38  ;;  %v492_v42 = vld [vmem:[#allocation2 + $0x1e0] sm:$0xff] }
 0x117   :  { %v306_v47 = vadd.f32 %v305_v43, %v304_v39  ;;  %v314_v48 = vrot.slane %v313_v44, 4  ;;  %v320_v49 = vadd.f32 %v2655_v41, %v2657_v45  ;;  %v327_v50 = vmul.f32 %v2657_v45, %v2657_v45  ;;  %v525_v39 = vld [vmem:[#allocation2 + $0x2e8] sm:$0xff]  ;;  %1875 = vmatprep.subr.mxu1 %v508_v40  ;;  %v524_v43 = vld [vmem:[#allocation2 + $0x2e0] sm:$0xff] }
 0x118   :  { %1876 = vmatpush3.msra.mxu1 %v492_v42 }
 0x119   :  { %v307_v51 = vrot.slane %v306_v47, 2  ;;  %v315_v52 = vadd.f32 %v314_v48, %v313_v44  ;;  %v321_v53 = vrot.slane %v320_v49, 4  ;;  %v329_v54 = vadd.f32 %v328_v46, %v327_v50  ;;  %v507_v44 = vld [vmem:[#allocation2 + $0x258] sm:$0xff]  ;;  %v506_v48 = vld [vmem:[#allocation2 + $0x250] sm:$0xff] }
 0x11a   :  { %1877 = vmatprep.subr.mxu1 %v507_v44  ;;  %v491_v46 = vld [vmem:[#allocation2 + $0x1d8] sm:$0xff]  ;;  %v522_v50 = vld [vmem:[#allocation2 + $0x2d0] sm:$0xff] }
 0x11b   :  { %v308_v55 = vadd.f32 %v307_v51, %v306_v47  ;;  %v316_v56 = vrot.slane %v315_v52, 2  ;;  %v322_v57 = vadd.f32 %v321_v53, %v320_v49  ;;  %v330_v58 = vrot.slane %v329_v54, 4  ;;  %v523_v47 = vld [vmem:[#allocation2 + $0x2d8] sm:$0xff]  ;;  %1878 = vmatpush3.msra.mxu1 %v491_v46  ;;  %v490_v49 = vld [vmem:[#allocation2 + $0x1d0] sm:$0xff]  ;;  %v505_v51 = vld [vmem:[#allocation2 + $0x248] sm:$0xff] }
 0x11c   :  { %1879 = vmatprep.subr.mxu1 %v506_v48  ;;  %v521_v53 = vld [vmem:[#allocation2 + $0x2c8] sm:$0xff] }
 0x11d   :  { %v309_v59 = vrot.slane %v308_v55, 1  ;;  %v317_v60 = vadd.f32 %v316_v56, %v315_v52  ;;  %v323_v61 = vrot.slane %v322_v57, 2  ;;  %v331_v62 = vadd.f32 %v330_v58, %v329_v54  ;;  %1880 = vmatpush3.msra.mxu1 %v490_v49  ;;  %v489_v52 = vld [vmem:[#allocation2 + $0x1c8] sm:$0xff]  ;;  %v504_v54 = vld [vmem:[#allocation2 + $0x240] sm:$0xff]  ;;  %v487_v58 = vld [vmem:[#allocation2 + $0x1b8] sm:$0xff] }
 0x11e   :  { %1881 = vmatprep.subr.mxu1 %v505_v51  ;;  %v520_v56 = vld [vmem:[#allocation2 + $0x2c0] sm:$0xff] }
 0x11f   :  { %v324_v63 = vadd.f32 %v323_v61, %v322_v57  ;;  %v318_v0 = vrot.slane %v317_v60, 1  ;;  %v332_v1 = vrot.slane %v331_v62, 2  ;;  %v310_v2 = vadd.f32 %v309_v59, %v308_v55  ;;  %1882 = vmatpush3.msra.mxu1 %v489_v52  ;;  %v488_v55 = vld [vmem:[#allocation2 + $0x1c0] sm:$0xff]  ;;  %v503_v57 = vld [vmem:[#allocation2 + $0x238] sm:$0xff]  ;;  %v486_v61 = vld [vmem:[#allocation2 + $0x1b0] sm:$0xff] }
 0x120   :  { %1883 = vmatprep.subr.mxu1 %v504_v54  ;;  %v519_v59 = vld [vmem:[#allocation2 + $0x2b8] sm:$0xff] }
 0x121   :  { %v319_v3 = vadd.f32 %v318_v0, %v317_v60  ;;  %v325_v21 = vrot.slane %v324_v63, 1  ;;  %v333_v22 = vadd.f32 %v332_v1, %v331_v62  ;;  %1884 = vmatpush3.msra.mxu1 %v488_v55  ;;  %v502_v60 = vld [vmem:[#allocation2 + $0x230] sm:$0xff]  ;;  %v485_v0 = vld [vmem:[#allocation2 + $0x1a8] sm:$0xff] }
 0x122   :  { %1885 = vmatprep.subr.mxu1 %v503_v57  ;;  %v518_v62 = vld [vmem:[#allocation2 + $0x2b0] sm:$0xff]  ;;  %v517_v1 = vld [vmem:[#allocation2 + $0x2a8] sm:$0xff] }
 0x123   :  { %v326_v23 = vadd.f32 %v325_v21, %v324_v63  ;;  %v334_v24 = vrot.slane %v333_v22, 1  ;;  %v336_v25 = vsel %vm56_vm0, %v310_v2, %v319_v3  ;;  %1886 = vmatpush3.msra.mxu1 %v487_v58  ;;  %v501_v63 = vld [vmem:[#allocation2 + $0x228] sm:$0xff]  ;;  %v500_v2 = vld [vmem:[#allocation2 + $0x220] sm:$0xff] }
 0x124   :  { %1887 = vmatprep.subr.mxu1 %v502_v60  ;;  %v484_v3 = vld [vmem:[#allocation2 + $0x1a0] sm:$0xff] }
 0x125   :  { %v335_v26 = vadd.f32 %v334_v24, %v333_v22  ;;  %v338_v27 = vsel %vm337_vm3, %v336_v25, %v326_v23  ;;  %1888 = vmatpush3.msra.mxu1 %v486_v61  ;;  %v516_v21 = vld [vmem:[#allocation2 + $0x2a0] sm:$0xff]  ;;  %v499_v22 = vld [vmem:[#allocation2 + $0x218] sm:$0xff]  ;;  %v498_v25 = vld [vmem:[#allocation2 + $0x210] sm:$0xff] }
 0x126   :  { %1889 = vmatprep.subr.mxu1 %v501_v63  ;;  %v483_v23 = vld [vmem:[#allocation2 + $0x198] sm:$0xff] }
 0x127   :  { %v340_v28 = vsel %vm339_vm4, %v338_v27, %v335_v26  ;;  %1890 = vmatpush3.msra.mxu1 %v485_v0  ;;  %v515_v24 = vld [vmem:[#allocation2 + $0x298] sm:$0xff]  ;;  %v482_v26 = vld [vmem:[#allocation2 + $0x190] sm:$0xff] }
 0x128   :  { %2183 = vmatmul.mubr.f32.vlgmr.msra.gmra.mxu0 %v340_v28  ;;  %1891 = vmatprep.subr.mxu1 %v500_v2  ;;  %v514_v27 = vld [vmem:[#allocation2 + $0x290] sm:$0xff]  ;;  %v497_v28 = vld [vmem:[#allocation2 + $0x208] sm:$0xff] }
 0x129   :  { %2186 = vmatpush3.msra.mxu0 %v527_v31  ;;  %1892 = vmatpush3.msra.mxu1 %v484_v3  ;;  %v496_v31 = vld [vmem:[#allocation2 + $0x200] sm:$0xff] }
 0x12a   :  { %2187 = vmatprep.subr.mxu0 %v526_v36  ;;  %1893 = vmatprep.subr.mxu1 %v499_v22 }
 0x12b   :  { %2188 = vmatpush3.msra.mxu0 %v526_v36  ;;  %1894 = vmatpush3.msra.mxu1 %v483_v23 }
 0x12c   :  { %2189 = vmatprep.subr.mxu0 %v525_v39  ;;  %1895 = vmatprep.subr.mxu1 %v498_v25 }
 0x12d   :  { %2190 = vmatpush3.msra.mxu0 %v525_v39  ;;  %1896 = vmatpush3.msra.mxu1 %v482_v26 }
 0x12e   :  { %2191 = vmatprep.subr.mxu0 %v524_v43  ;;  %1897 = vmatprep.subr.mxu1 %v497_v28 }
 0x12f   :  { %2192 = vmatpush3.msra.mxu0 %v524_v43  ;;  %1898 = vmatpush3.msra.mxu1 %v481_v29  ;;  %v417_v43 = vlaneseq }
 0x130   :  { %2193 = vmatprep.subr.mxu0 %v523_v47  ;;  %1899 = vmatprep.subr.mxu1 %v496_v31 }
 0x131   :  { %2194 = vmatpush3.msra.mxu0 %v523_v47  ;;  %1900 = vmatpush3.msra.mxu1 %v480_v33  ;;  %v418_v46 = vshrl.u32 %v417_v43, 7 }
 0x132   :  { %2195 = vmatprep.subr.mxu0 %v522_v50  ;;  %2223 = vmatprep.subr.mxu1 %v2462_v5 }
 0x133   :  { %2196 = vmatpush3.msra.mxu0 %v522_v50  ;;  %v2669_v47 = vsub.s32 0, %v418_v46  ;;  %v2671_v48 = vsub.s32 2, %v418_v46  ;;  %v2675_v51 = vsub.s32 3, %v418_v46  ;;  %v2677_v52 = vsub.s32 1, %v418_v46 }
 0x134   :  { %2197 = vmatprep.subr.mxu0 %v521_v53 }
 0x135   :  { %2198 = vmatpush3.msra.mxu0 %v521_v53 }
 0x136   :  { %2199 = vmatprep.subr.mxu0 %v520_v56 }
 0x137   :  { %2200 = vmatpush3.msra.mxu0 %v520_v56 }
 0x138   :  { %2201 = vmatprep.subr.mxu0 %v519_v59 }
 0x139   :  { %2202 = vmatpush3.msra.mxu0 %v519_v59 }
 0x13a   :  { %2203 = vmatprep.subr.mxu0 %v518_v62 }
 0x13b   :  { %2204 = vmatpush3.msra.mxu0 %v518_v62 }
 0x13c   :  { %2205 = vmatprep.subr.mxu0 %v517_v1 }
 0x13d   :  { %2206 = vmatpush3.msra.mxu0 %v517_v1 }
 0x13e   :  { %2207 = vmatprep.subr.mxu0 %v516_v21 }
 0x13f   :  { %2208 = vmatpush3.msra.mxu0 %v516_v21 }
 0x140   :  { %2209 = vmatprep.subr.mxu0 %v515_v24 }
 0x141   :  { %2210 = vmatpush3.msra.mxu0 %v515_v24 }
 0x142   :  { %2211 = vmatprep.subr.mxu0 %v514_v27 }
 0x143   :  { %2212 = vmatpush3.msra.mxu0 %v514_v27 }
 0x144   :  { %2213 = vmatprep.subr.mxu0 %v513_v30 }
 0x145   :  { %2214 = vmatpush3.msra.mxu0 %v513_v30 }
 0x146   :  { %2215 = vmatprep.subr.mxu0 %v512_v34 }
 0x147   :  { %2216 = vmatpush3.msra.mxu0 %v512_v34 }
 0x1e8   :  { %v407_v36 = vpop.f32.mrf.mxu0 }
 0x1e9   :  { %v411_v37 = vmul.f32 %v407_v36, %v407_v36  ;;  %v420_v49 = vrot.slane %v407_v36, %v2669_v47  ;;  %v436_v50 = vrot.slane %v407_v36, %v2671_v48 }
 0x1ea   :  { %v2184_v38 = vpop.f32.mrf.mxu0 }
 0x1eb   :  { %v413_v39 = vrot.slane %v411_v37, 7  ;;  %v422_v54 = vsub.f32 %v2645_v32, %v420_v49  ;;  %v437_v55 = vsub.f32 %v2657_v45, %v436_v50  ;;  %v438_v56 = vsub.f32 %v2655_v41, %v436_v50 }
 0x1ec   :  { %v421_v58 = vsub.f32 %v2647_v35, %v420_v49 }
 0x1ed   :  { %v415_v40 = vsub.f32 %v407_v36, %v413_v39 }
 0x1ef   :  { %v416_v42 = vmax.f32 %v415_v40, 0.0 }
 0x1f1   :  { %v423_v44 = vadd.f32 1e-05, %v416_v42 }
 0x1f3   :  { %2409 = vrsqrt.f32 %v423_v44 }
 0x200   :  { %v2410_v53 = vpop.eup %2409 }
 0x201   :  { %v442_v57 = vrot.slane %v2410_v53, %v2675_v51  ;;  %v428_v59 = vrot.slane %v2410_v53, %v2677_v52 }
 0x203   :  { %v443_v60 = vmul.f32 %v442_v57, %v437_v55  ;;  %v444_v61 = vmul.f32 %v442_v57, %v438_v56  ;;  %v429_v62 = vmul.f32 %v428_v59, %v421_v58  ;;  %v430_v63 = vmul.f32 %v428_v59, %v422_v54 }
 0x205   :  { %v445_v0 = vmax.f32 %v443_v60, 0.0  ;;  %v446_v1 = vmax.f32 %v444_v61, 0.0  ;;  %v431_v2 = vmax.f32 %v429_v62, 0.0  ;;  %v432_v3 = vmax.f32 %v430_v63, 0.0 }
 0x207   :  { %v448_v21 = vrot.slane %v431_v2, 1  ;;  %v451_v32 = vrot.slane %v431_v2, 7  ;;  %592 = vmatprep.mubr.f32.mxu1 %v431_v2  ;;  %v457_v45 = vrot.slane %v432_v3, 1  ;;  %v452_v22 = vrot.slane %v432_v3, 7 }
 0x208   :  { %v464_v41 = vrot.slane %v445_v0, 1  ;;  %v473_v23 = vrot.slane %v446_v1, 1  ;;  %v468_v26 = vrot.slane %v446_v1, 7  ;;  %v467_v29 = vrot.slane %v445_v0, 7 }
 0x209   :  { %v456_v24 = vsel %vm56_vm0, %v448_v21, %v451_v32  ;;  %v458_v35 = vsel %vm63_vm1, %v448_v21, %v457_v45  ;;  %v462_v25 = vsel %vm63_vm1, %v457_v45, %v452_v22  ;;  %v453_v28 = vsel %vm56_vm0, %v451_v32, %v452_v22 }
 0x20a   :  { %593 = vmatmul.mubr.f32.vlgmr.msra.gmra.mxu1 %v456_v24  ;;  %2217 = vmatprep.mubr.f32.mxu0 %v458_v35  ;;  %v474_v27 = vsel %vm63_vm1, %v464_v41, %v473_v23  ;;  %v478_v30 = vsel %vm63_vm1, %v473_v23, %v468_v26  ;;  %v472_v31 = vsel %vm56_vm0, %v464_v41, %v467_v29 }
 0x20b   :  { %597 = vmatprep.mubr.f32.mxu1 %v432_v3  ;;  %2218 = vmatmul.mubr.f32.vlgmr.msra.gmra.mxu0 %v462_v25 }
 0x20c   :  { %2220 = vmatprep.mubr.f32.mxu0 %v474_v27  ;;  %2224 = vmatpush3.msra.mxu1 %v2534_v4  ;;  %v469_v4 = vsel %vm56_vm0, %v467_v29, %v468_v26  ;;  %v899_v29 = vld [vmem:[#allocation2 + $0x3f8] sm:$0xff] }
 0x20d   :  { %2225 = vmatprep.subr.mxu1 %v2462_v5  ;;  %1950 = vmatprep.subr.mxu0 %v899_v29 }
 0x20e   :  { %598 = vmatmul.mubr.f32.gmra.mxu1 %v453_v28 }
 0x20f   :  { %602 = vmatprep.mubr.f32.mxu1 %v445_v0  ;;  %2221 = vmatmul.mubr.f32.gmra.mxu0 %v478_v30  ;;  %v883_v30 = vld [vmem:[#allocation2 + $0x378] sm:$0xff] }
 0x210   :  { %2226 = vmatpush3.msra.mxu1 %v2542_v6  ;;  %1951 = vmatpush3.msra.mxu0 %v883_v30 }
 0x211   :  { %2227 = vmatprep.subr.mxu1 %v2462_v5 }
 0x212   :  { %603 = vmatmul.mubr.f32.gmra.mxu1 %v472_v31  ;;  %v915_v31 = vld [vmem:[#allocation2 + $0x478] sm:$0xff] }
 0x213   :  { %607 = vmatprep.mubr.f32.mxu1 %v446_v1  ;;  %2228 = vmatpush3.msra.mxu1 %v2547_v7 }
 0x214   :  { %2229 = vmatprep.subr.mxu1 %v2462_v5 }
 0x215   :  { %2230 = vmatpush3.msra.mxu1 %v2556_v8 }
 0x216   :  { %608 = vmatmul.mubr.f32.gmra.mxu1 %v469_v4  ;;  %2231 = vmatprep.subr.mxu1 %v2462_v5  ;;  %v898_v4 = vld [vmem:[#allocation2 + $0x3f0] sm:$0xff] }
 0x217   :  { %2232 = vmatpush3.msra.mxu1 %v2563_v9  ;;  %2255 = vmatprep.mubr.msk.f32.mxu1 %vm2463_vm2, %v2462_v5 }
 0x218   :  { %2233 = vmatprep.subr.mxu1 %v2462_v5  ;;  %1952 = vmatprep.subr.mxu0 %v898_v4 }
 0x219   :  { %2234 = vmatpush3.msra.mxu1 %v2570_v10 }
 0x21a   :  { %2235 = vmatprep.subr.mxu1 %v2462_v5 }
 0x21b   :  { %2236 = vmatpush3.msra.mxu1 %v2577_v11 }
 0x21c   :  { %2237 = vmatprep.subr.mxu1 %v2462_v5 }
 0x21d   :  { %2238 = vmatpush3.msra.mxu1 %v2584_v12 }
 0x21e   :  { %2239 = vmatprep.subr.mxu1 %v2462_v5 }
 0x21f   :  { %2240 = vmatpush3.msra.mxu1 %v2591_v13 }
 0x220   :  { %2241 = vmatprep.subr.mxu1 %v2462_v5 }
 0x221   :  { %2242 = vmatpush3.msra.mxu1 %v2598_v14 }
 0x222   :  { %2243 = vmatprep.subr.mxu1 %v2462_v5 }
 0x223   :  { %2244 = vmatpush3.msra.mxu1 %v2605_v15 }
 0x224   :  { %2245 = vmatprep.subr.mxu1 %v2462_v5 }
 0x225   :  { %2246 = vmatpush3.msra.mxu1 %v2612_v16 }
 0x226   :  { %2247 = vmatprep.subr.mxu1 %v2462_v5 }
 0x227   :  { %2248 = vmatpush3.msra.mxu1 %v2618_v17 }
 0x228   :  { %2249 = vmatprep.subr.mxu1 %v2462_v5 }
 0x229   :  { %2250 = vmatpush3.msra.mxu1 %v2624_v18 }
 0x22a   :  { %2251 = vmatprep.subr.mxu1 %v2462_v5 }
 0x22b   :  { %2252 = vmatpush3.msra.mxu1 %v2633_v19 }
 0x22c   :  { %2253 = vmatprep.subr.mxu1 %v2462_v5 }
 0x22d   :  { %2254 = vmatpush3.msra.mxu1 %v2640_v20 }
 0x22e   :  { %2258 = vmatprep.subr.mxu1 %v915_v31 }
 0x2ca   :  { %v1901_v6 = vpop.f32.mrf.mxu1 }
 0x2cb   :  { %v2219_v7 = vpop.f32.mrf.mxu0 }
 0x2cc   :  { %v1902_v8 = vpop.f32.mrf.mxu1 }
 0x2cd   :  { %v1903_v9 = vadd.f32 %v1902_v8, %v1901_v6  ;;  %v679_v10 = vpop.f32.mrf.mxu0  ;;  %v882_v6 = vld [vmem:[#allocation2 + $0x370] sm:$0xff]  ;;  %v897_v8 = vld [vmem:[#allocation2 + $0x3e8] sm:$0xff] }
 0x2ce   :  { %v1904_v11 = vpop.f32.mrf.mxu1  ;;  %1953 = vmatpush3.msra.mxu0 %v882_v6 }
 0x2cf   :  { %v2726_v13 = vadd.f32 %v1903_v9, %v679_v10  ;;  %v2222_v17 = vpop.f32.mrf.mxu0  ;;  %1954 = vmatprep.subr.mxu0 %v897_v8  ;;  %v881_v9 = vld [vmem:[#allocation2 + $0x368] sm:$0xff] }
 0x2d0   :  { %v1905_v12 = vpop.f32.mrf.mxu1  ;;  %v913_v10 = vld [vmem:[#allocation2 + $0x468] sm:$0xff]  ;;  %1955 = vmatpush3.msra.mxu0 %v881_v9 }
 0x2d1   :  { %v1906_v14 = vadd.f32 %v1905_v12, %v1904_v11  ;;  %v705_v19 = vmul.f32 %v2726_v13, %v2726_v13  ;;  %v689_v39 = vpop.f32.mrf.mxu0  ;;  %v896_v11 = vld [vmem:[#allocation2 + $0x3e0] sm:$0xff] }
 0x2d2   :  { %v1907_v15 = vpop.f32.mrf.mxu1  ;;  %1956 = vmatprep.subr.mxu0 %v896_v11  ;;  %v880_v12 = vld [vmem:[#allocation2 + $0x360] sm:$0xff] }
 0x2d3   :  { %v2728_v16 = vadd.f32 %v2219_v7, %v1906_v14  ;;  %v914_v7 = vld [vmem:[#allocation2 + $0x470] sm:$0xff]  ;;  %v912_v14 = vld [vmem:[#allocation2 + $0x460] sm:$0xff]  ;;  %1957 = vmatpush3.msra.mxu0 %v880_v12 }
 0x2d4   :  { %v1908_v18 = vpop.f32.mrf.mxu1 }
 0x2d5   :  { %v698_v20 = vadd.f32 %v2728_v16, %v2726_v13  ;;  %v706_v33 = vmul.f32 %v2728_v16, %v2728_v16  ;;  %v1909_v34 = vadd.f32 %v1908_v18, %v1907_v15  ;;  %v895_v15 = vld [vmem:[#allocation2 + $0x3d8] sm:$0xff] }
 0x2d6   :  { %v1910_v36 = vpop.f32.mrf.mxu1  ;;  %1958 = vmatprep.subr.mxu0 %v895_v15  ;;  %v911_v18 = vld [vmem:[#allocation2 + $0x458] sm:$0xff] }
 0x2d7   :  { %v699_v37 = vrot.slane %v698_v20, 4  ;;  %v707_v38 = vadd.f32 %v706_v33, %v705_v19  ;;  %v2736_v44 = vadd.f32 %v1909_v34, %v689_v39  ;;  %v894_v19 = vld [vmem:[#allocation2 + $0x3d0] sm:$0xff]  ;;  %v893_v34 = vld [vmem:[#allocation2 + $0x3c8] sm:$0xff]  ;;  %v876_v39 = vld [vmem:[#allocation2 + $0x340] sm:$0xff] }
 0x2d8   :  { %v1911_v40 = vpop.f32.mrf.mxu1  ;;  %v910_v33 = vld [vmem:[#allocation2 + $0x450] sm:$0xff] }
 0x2d9   :  { %v700_v42 = vadd.f32 %v699_v37, %v698_v20  ;;  %v708_v43 = vrot.slane %v707_v38, 4  ;;  %v1912_v46 = vadd.f32 %v1911_v40, %v1910_v36  ;;  %v721_v55 = vmul.f32 %v2736_v44, %v2736_v44  ;;  %v878_v20 = vld [vmem:[#allocation2 + $0x350] sm:$0xff]  ;;  %v877_v36 = vld [vmem:[#allocation2 + $0x348] sm:$0xff]  ;;  %v908_v40 = vld [vmem:[#allocation2 + $0x440] sm:$0xff] }
 0x2da   :  { %v909_v37 = vld [vmem:[#allocation2 + $0x448] sm:$0xff] }
 0x2db   :  { %v709_v49 = vadd.f32 %v708_v43, %v707_v38  ;;  %v2738_v50 = vadd.f32 %v2222_v17, %v1912_v46  ;;  %v701_v53 = vrot.slane %v700_v42, 2  ;;  %v879_v17 = vld [vmem:[#allocation2 + $0x358] sm:$0xff]  ;;  %v892_v38 = vld [vmem:[#allocation2 + $0x3c0] sm:$0xff] }
 0x2dc   :  { %1959 = vmatpush3.msra.mxu0 %v879_v17  ;;  %v875_v43 = vld [vmem:[#allocation2 + $0x338] sm:$0xff] }
 0x2dd   :  { %v710_v54 = vrot.slane %v709_v49, 2  ;;  %v714_v56 = vadd.f32 %v2738_v50, %v2736_v44  ;;  %v722_v57 = vmul.f32 %v2738_v50, %v2738_v50  ;;  %v702_v61 = vadd.f32 %v701_v53, %v700_v42  ;;  %1960 = vmatprep.subr.mxu0 %v894_v19  ;;  %v891_v42 = vld [vmem:[#allocation2 + $0x3b8] sm:$0xff]  ;;  %v874_v53 = vld [vmem:[#allocation2 + $0x330] sm:$0xff] }
 0x2de   :  { %1961 = vmatpush3.msra.mxu0 %v878_v20  ;;  %v907_v46 = vld [vmem:[#allocation2 + $0x438] sm:$0xff] }
 0x2df   :  { %v711_v58 = vadd.f32 %v710_v54, %v709_v49  ;;  %v715_v59 = vrot.slane %v714_v56, 4  ;;  %v723_v60 = vadd.f32 %v722_v57, %v721_v55  ;;  %v703_v3 = vrot.slane %v702_v61, 1  ;;  %1962 = vmatprep.subr.mxu0 %v893_v34  ;;  %v890_v49 = vld [vmem:[#allocation2 + $0x3b0] sm:$0xff]  ;;  %v889_v55 = vld [vmem:[#allocation2 + $0x3a8] sm:$0xff] }
 0x2e0   :  { %1963 = vmatpush3.msra.mxu0 %v877_v36  ;;  %v906_v54 = vld [vmem:[#allocation2 + $0x430] sm:$0xff]  ;;  %v905_v57 = vld [vmem:[#allocation2 + $0x428] sm:$0xff] }
 0x2e1   :  { %v716_v62 = vadd.f32 %v715_v59, %v714_v56  ;;  %v724_v63 = vrot.slane %v723_v60, 4  ;;  %v712_v0 = vrot.slane %v711_v58, 1  ;;  %v704_v23 = vadd.f32 %v703_v3, %v702_v61  ;;  %1964 = vmatprep.subr.mxu0 %v892_v38  ;;  %v873_v56 = vld [vmem:[#allocation2 + $0x328] sm:$0xff]  ;;  %v872_v59 = vld [vmem:[#allocation2 + $0x320] sm:$0xff]  ;;  %v887_v61 = vld [vmem:[#allocation2 + $0x398] sm:$0xff] }
 0x2e2   :  { %1965 = vmatpush3.msra.mxu0 %v876_v39  ;;  %v885_v3 = vld [vmem:[#allocation2 + $0x388] sm:$0xff] }
 0x2e3   :  { %v717_v1 = vrot.slane %v716_v62, 2  ;;  %v725_v2 = vadd.f32 %v724_v63, %v723_v60  ;;  %v713_v45 = vadd.f32 %v712_v0, %v711_v58  ;;  %1966 = vmatprep.subr.mxu0 %v891_v42  ;;  %v888_v58 = vld [vmem:[#allocation2 + $0x3a0] sm:$0xff]  ;;  %v903_v63 = vld [vmem:[#allocation2 + $0x418] sm:$0xff]  ;;  %v886_v0 = vld [vmem:[#allocation2 + $0x390] sm:$0xff] }
 0x2e4   :  { %1967 = vmatpush3.msra.mxu0 %v875_v43  ;;  %v904_v60 = vld [vmem:[#allocation2 + $0x420] sm:$0xff]  ;;  %v2774_v42 = vld [vmem:[%s3213_s2 + $0x70] sm:$0xff] }
 0x2e5   :  { %v718_v21 = vadd.f32 %v717_v1, %v716_v62  ;;  %v726_v32 = vrot.slane %v725_v2, 2  ;;  %v730_v25 = vsel %vm56_vm0, %v704_v23, %v713_v45  ;;  %1968 = vmatprep.subr.mxu0 %v890_v49  ;;  %v871_v62 = vld [vmem:[#allocation2 + $0x318] sm:$0xff]  ;;  %v870_v1 = vld [vmem:[#allocation2 + $0x310] sm:$0xff]  ;;  %v884_v45 = vld [vmem:[#allocation2 + $0x380] sm:$0xff] }
 0x2e6   :  { %1969 = vmatpush3.msra.mxu0 %v874_v53  ;;  %v2790_v53 = vld [vmem:[%s3213_s2 + $0x60] sm:$0xff] }
 0x2e7   :  { %v719_v22 = vrot.slane %v718_v21, 1  ;;  %v727_v41 = vadd.f32 %v726_v32, %v725_v2  ;;  %1970 = vmatprep.subr.mxu0 %v889_v55  ;;  %v902_v2 = vld [vmem:[#allocation2 + $0x410] sm:$0xff]  ;;  %v901_v32 = vld [vmem:[#allocation2 + $0x408] sm:$0xff] }
 0x2e8   :  { %1971 = vmatpush3.msra.mxu0 %v873_v56  ;;  %v2806_v55 = vld [vmem:[%s3213_s2 + $0x50] sm:$0xff]  ;;  %v2813_v56 = vld [vmem:[%s3213_s2 + $0x48] sm:$0xff] }
 0x2e9   :  { %v720_v24 = vadd.f32 %v719_v22, %v718_v21  ;;  %v728_v35 = vrot.slane %v727_v41, 1  ;;  %1972 = vmatprep.subr.mxu0 %v888_v58  ;;  %v869_v21 = vld [vmem:[#allocation2 + $0x308] sm:$0xff]  ;;  %v868_v22 = vld [vmem:[#allocation2 + $0x300] sm:$0xff]  ;;  %v2827_v58 = vld [vmem:[%s3213_s2 + $0x38] sm:$0xff] }
 0x2ea   :  { %1973 = vmatpush3.msra.mxu0 %v872_v59  ;;  %v2834_v59 = vld [vmem:[%s3213_s2 + $0x30] sm:$0xff] }
 0x2eb   :  { %v729_v26 = vadd.f32 %v728_v35, %v727_v41  ;;  %v731_v27 = vsel %vm337_vm3, %v730_v25, %v720_v24  ;;  %1974 = vmatprep.subr.mxu0 %v887_v61  ;;  %v900_v41 = vld [vmem:[#allocation2 + $0x400] sm:$0xff] }
 0x2ec   :  { %1975 = vmatpush3.msra.mxu0 %v871_v62  ;;  %v2848_v61 = vld [vmem:[%s3213_s2 + $0x20] sm:$0xff]  ;;  %v2855_v62 = vld [vmem:[%s3213_s2 + $0x18] sm:$0xff] }
 0x2ed   :  { %v732_v28 = vsel %vm339_vm4, %v731_v27, %v729_v26  ;;  %1976 = vmatprep.subr.mxu0 %v886_v0  ;;  %v2869_v0 = vld [vmem:[%s3213_s2 + $0x8] sm:$0xff] }
 0x2ee   :  { %2256 = vmatmul.mubr.f32.vlgmr.msra.gmra.mxu1 %v732_v28  ;;  %1977 = vmatpush3.msra.mxu0 %v870_v1  ;;  %v2876_v1 = vld [vmem:[%s3213_s2] sm:$0xff] }
 0x2ef   :  { %2259 = vmatpush3.msra.mxu1 %v915_v31  ;;  %1978 = vmatprep.subr.mxu0 %v885_v3 }
 0x2f0   :  { %2260 = vmatprep.subr.mxu1 %v914_v7  ;;  %1979 = vmatpush3.msra.mxu0 %v869_v21 }
 0x2f1   :  { %2261 = vmatpush3.msra.mxu1 %v914_v7  ;;  %1980 = vmatprep.subr.mxu0 %v884_v45 }
 0x2f2   :  { %2262 = vmatprep.subr.mxu1 %v913_v10  ;;  %1981 = vmatpush3.msra.mxu0 %v868_v22 }
 0x2f3   :  { %2263 = vmatpush3.msra.mxu1 %v913_v10  ;;  %2296 = vmatprep.subr.mxu0 %v2462_v5 }
 0x2f4   :  { %2264 = vmatprep.subr.mxu1 %v912_v14 }
 0x2f5   :  { %2265 = vmatpush3.msra.mxu1 %v912_v14 }
 0x2f6   :  { %2266 = vmatprep.subr.mxu1 %v911_v18 }
 0x2f7   :  { %2267 = vmatpush3.msra.mxu1 %v911_v18 }
 0x2f8   :  { %2268 = vmatprep.subr.mxu1 %v910_v33 }
 0x2f9   :  { %2269 = vmatpush3.msra.mxu1 %v910_v33 }
 0x2fa   :  { %2270 = vmatprep.subr.mxu1 %v909_v37 }
 0x2fb   :  { %2271 = vmatpush3.msra.mxu1 %v909_v37  ;;  %v2765_v37 = vld [vmem:[%s3213_s2 + $0x78] sm:$0xff] }
 0x2fc   :  { %2272 = vmatprep.subr.mxu1 %v908_v40 }
 0x2fd   :  { %2273 = vmatpush3.msra.mxu1 %v908_v40 }
 0x2fe   :  { %2274 = vmatprep.subr.mxu1 %v907_v46 }
 0x2ff   :  { %2275 = vmatpush3.msra.mxu1 %v907_v46  ;;  %v2782_v46 = vld [vmem:[%s3213_s2 + $0x68] sm:$0xff] }
 0x300   :  { %2276 = vmatprep.subr.mxu1 %v906_v54 }
 0x301   :  { %2277 = vmatpush3.msra.mxu1 %v906_v54  ;;  %v2797_v54 = vld [vmem:[%s3213_s2 + $0x58] sm:$0xff] }
 0x302   :  { %2278 = vmatprep.subr.mxu1 %v905_v57 }
 0x303   :  { %2279 = vmatpush3.msra.mxu1 %v905_v57  ;;  %v2820_v57 = vld [vmem:[%s3213_s2 + $0x40] sm:$0xff] }
 0x304   :  { %2280 = vmatprep.subr.mxu1 %v904_v60 }
 0x305   :  { %2281 = vmatpush3.msra.mxu1 %v904_v60  ;;  %v2841_v60 = vld [vmem:[%s3213_s2 + $0x28] sm:$0xff] }
 0x306   :  { %2282 = vmatprep.subr.mxu1 %v903_v63 }
 0x307   :  { %2283 = vmatpush3.msra.mxu1 %v903_v63  ;;  %v2862_v63 = vld [vmem:[%s3213_s2 + $0x10] sm:$0xff] }
 0x308   :  { %2284 = vmatprep.subr.mxu1 %v902_v2 }
 0x309   :  { %2285 = vmatpush3.msra.mxu1 %v902_v2 }
 0x30a   :  { %2286 = vmatprep.subr.mxu1 %v901_v32 }
 0x30b   :  { %2287 = vmatpush3.msra.mxu1 %v901_v32 }
 0x30c   :  { %2288 = vmatprep.subr.mxu1 %v900_v41 }
 0x30d   :  { %2289 = vmatpush3.msra.mxu1 %v900_v41 }
 0x3ae   :  { %v799_v23 = vpop.f32.mrf.mxu1 }
 0x3af   :  { %v803_v24 = vmul.f32 %v799_v23, %v799_v23  ;;  %v812_v29 = vrot.slane %v799_v23, %v2669_v47  ;;  %v826_v30 = vrot.slane %v799_v23, %v2671_v48 }
 0x3b0   :  { %v2257_v35 = vpop.f32.mrf.mxu1 }
 0x3b1   :  { %v805_v25 = vrot.slane %v803_v24, 7  ;;  %v814_v4 = vsub.f32 %v2728_v16, %v812_v29  ;;  %v827_v6 = vsub.f32 %v2736_v44, %v826_v30  ;;  %v828_v7 = vsub.f32 %v2738_v50, %v826_v30 }
 0x3b2   :  { %v813_v9 = vsub.f32 %v2726_v13, %v812_v29 }
 0x3b3   :  { %v807_v26 = vsub.f32 %v799_v23, %v805_v25 }
 0x3b5   :  { %v808_v27 = vmax.f32 %v807_v26, 0.0 }
 0x3b7   :  { %v815_v28 = vadd.f32 1e-05, %v808_v27 }
 0x3b9   :  { %2411 = vrsqrt.f32 %v815_v28 }
 0x3c6   :  { %v2412_v31 = vpop.eup %2411 }
 0x3c7   :  { %v832_v8 = vrot.slane %v2412_v31, %v2675_v51  ;;  %v820_v10 = vrot.slane %v2412_v31, %v2677_v52 }
 0x3c9   :  { %v833_v11 = vmul.f32 %v832_v8, %v827_v6  ;;  %v834_v12 = vmul.f32 %v832_v8, %v828_v7  ;;  %v821_v14 = vmul.f32 %v820_v10, %v813_v9  ;;  %v822_v15 = vmul.f32 %v820_v10, %v814_v4 }
 0x3cb   :  { %v836_v17 = vrot.slane %v821_v14, 1  ;;  %v839_v18 = vrot.slane %v821_v14, 7  ;;  %980 = vmatprep.mubr.f32.mxu0 %v821_v14  ;;  %v845_v19 = vrot.slane %v822_v15, 1  ;;  %v840_v20 = vrot.slane %v822_v15, 7 }
 0x3cc   :  { %v852_v16 = vrot.slane %v833_v11, 1  ;;  %v861_v33 = vrot.slane %v834_v12, 1  ;;  %v856_v13 = vrot.slane %v834_v12, 7  ;;  %v855_v39 = vrot.slane %v833_v11, 7 }
 0x3cd   :  { %v844_v44 = vsel %vm56_vm0, %v836_v17, %v839_v18  ;;  %v846_v50 = vsel %vm63_vm1, %v836_v17, %v845_v19  ;;  %v850_v34 = vsel %vm63_vm1, %v845_v19, %v840_v20  ;;  %v841_v38 = vsel %vm56_vm0, %v839_v18, %v840_v20 }
 0x3ce   :  { %981 = vmatmul.mubr.f32.vlgmr.msra.gmra.mxu0 %v844_v44  ;;  %2290 = vmatprep.mubr.f32.mxu1 %v846_v50  ;;  %v862_v36 = vsel %vm63_vm1, %v852_v16, %v861_v33  ;;  %v866_v40 = vsel %vm63_vm1, %v861_v33, %v856_v13  ;;  %v860_v43 = vsel %vm56_vm0, %v852_v16, %v855_v39 }
 0x3cf   :  { %985 = vmatprep.mubr.f32.mxu0 %v822_v15  ;;  %2291 = vmatmul.mubr.f32.vlgmr.msra.gmra.mxu1 %v850_v34  ;;  %v857_v49 = vsel %vm56_vm0, %v855_v39, %v856_v13 }
 0x3d0   :  { %2293 = vmatprep.mubr.f32.mxu1 %v862_v36  ;;  %2297 = vmatpush3.msra.mxu0 %v2765_v37 }
 0x3d1   :  { %2298 = vmatprep.subr.mxu0 %v2462_v5 }
 0x3d2   :  { %986 = vmatmul.mubr.f32.gmra.mxu0 %v841_v38 }
 0x3d3   :  { %990 = vmatprep.mubr.f32.mxu0 %v833_v11  ;;  %2294 = vmatmul.mubr.f32.gmra.mxu1 %v866_v40 }
 0x3d4   :  { %2299 = vmatpush3.msra.mxu0 %v2774_v42 }
 0x3d5   :  { %2300 = vmatprep.subr.mxu0 %v2462_v5 }
 0x3d6   :  { %991 = vmatmul.mubr.f32.gmra.mxu0 %v860_v43 }
 0x3d7   :  { %995 = vmatprep.mubr.f32.mxu0 %v834_v12  ;;  %2301 = vmatpush3.msra.mxu0 %v2782_v46 }
 0x3d8   :  { %2302 = vmatprep.subr.mxu0 %v2462_v5 }
 0x3d9   :  { %2303 = vmatpush3.msra.mxu0 %v2790_v53 }
 0x3da   :  { %996 = vmatmul.mubr.f32.gmra.mxu0 %v857_v49  ;;  %2304 = vmatprep.subr.mxu0 %v2462_v5 }
 0x3db   :  { %2305 = vmatpush3.msra.mxu0 %v2797_v54  ;;  %2328 = vmatprep.mubr.msk.f32.mxu0 %vm2463_vm2, %v2462_v5 }
 0x3dc   :  { %2306 = vmatprep.subr.mxu0 %v2462_v5 }
 0x3dd   :  { %2307 = vmatpush3.msra.mxu0 %v2806_v55 }
 0x3de   :  { %2308 = vmatprep.subr.mxu0 %v2462_v5 }
 0x3df   :  { %2309 = vmatpush3.msra.mxu0 %v2813_v56 }
 0x3e0   :  { %2310 = vmatprep.subr.mxu0 %v2462_v5 }
 0x3e1   :  { %2311 = vmatpush3.msra.mxu0 %v2820_v57 }
 0x3e2   :  { %2312 = vmatprep.subr.mxu0 %v2462_v5 }
 0x3e3   :  { %2313 = vmatpush3.msra.mxu0 %v2827_v58 }
 0x3e4   :  { %2314 = vmatprep.subr.mxu0 %v2462_v5 }
 0x3e5   :  { %2315 = vmatpush3.msra.mxu0 %v2834_v59 }
 0x3e6   :  { %2316 = vmatprep.subr.mxu0 %v2462_v5 }
 0x3e7   :  { %2317 = vmatpush3.msra.mxu0 %v2841_v60 }
 0x3e8   :  { %2318 = vmatprep.subr.mxu0 %v2462_v5 }
 0x3e9   :  { %2319 = vmatpush3.msra.mxu0 %v2848_v61 }
 0x3ea   :  { %2320 = vmatprep.subr.mxu0 %v2462_v5 }
 0x3eb   :  { %2321 = vmatpush3.msra.mxu0 %v2855_v62 }
 0x3ec   :  { %2322 = vmatprep.subr.mxu0 %v2462_v5 }
 0x3ed   :  { %2323 = vmatpush3.msra.mxu0 %v2862_v63 }
 0x3ee   :  { %2324 = vmatprep.subr.mxu0 %v2462_v5 }
 0x3ef   :  { %2325 = vmatpush3.msra.mxu0 %v2869_v0 }
 0x3f0   :  { %2326 = vmatprep.subr.mxu0 %v2462_v5 }
 0x3f1   :  { %2327 = vmatpush3.msra.mxu0 %v2876_v1 }
 0x48e   :  { %v1982_v2 = vpop.f32.mrf.mxu0 }
 0x48f   :  { %v2292_v3 = vpop.f32.mrf.mxu1 }
 0x490   :  { %v1983_v21 = vpop.f32.mrf.mxu0 }
 0x491   :  { %v1984_v32 = vadd.f32 %v1983_v21, %v1982_v2  ;;  %v1067_v45 = vpop.f32.mrf.mxu1 }
 0x492   :  { %v1985_v22 = vpop.f32.mrf.mxu0 }
 0x493   :  { %v2879_v23 = vadd.f32 %v1984_v32, %v1067_v45  ;;  %v2295_v26 = vpop.f32.mrf.mxu1 }
 0x494   :  { %v1986_v41 = vpop.f32.mrf.mxu0 }
 0x495   :  { %v1987_v24 = vadd.f32 %v1986_v41, %v1985_v22  ;;  %v1093_v28 = vmul.f32 %v2879_v23, %v2879_v23  ;;  %v1077_v8 = vpop.f32.mrf.mxu1 }
 0x496   :  { %v1988_v35 = vpop.f32.mrf.mxu0 }
 0x497   :  { %v2881_v25 = vadd.f32 %v2292_v3, %v1987_v24 }
 0x498   :  { %v1989_v27 = vpop.f32.mrf.mxu0 }
 0x499   :  { %v1086_v29 = vadd.f32 %v2881_v25, %v2879_v23  ;;  %v1094_v30 = vmul.f32 %v2881_v25, %v2881_v25  ;;  %v1990_v31 = vadd.f32 %v1989_v27, %v1988_v35 }
 0x49a   :  { %v1991_v4 = vpop.f32.mrf.mxu0 }
 0x49b   :  { %v1087_v6 = vrot.slane %v1086_v29, 4  ;;  %v1095_v7 = vadd.f32 %v1094_v30, %v1093_v28  ;;  %v2889_v12 = vadd.f32 %v1990_v31, %v1077_v8  ;;  %v1275_v30 = vld [vmem:[#allocation2 + $0x4f8] sm:$0xff]  ;;  %v1289_v8 = vld [vmem:[#allocation2 + $0x568] sm:$0xff] }
 0x49c   :  { %v1992_v9 = vpop.f32.mrf.mxu0  ;;  %v1307_v31 = vld [vmem:[#allocation2 + $0x5f8] sm:$0xff] }
 0x49d   :  { %v1088_v10 = vadd.f32 %v1087_v6, %v1086_v29  ;;  %v1096_v11 = vrot.slane %v1095_v7, 4  ;;  %v1993_v14 = vadd.f32 %v1992_v9, %v1991_v4  ;;  %v1109_v20 = vmul.f32 %v2889_v12, %v2889_v12  ;;  %v1291_v29 = vld [vmem:[#allocation2 + $0x578] sm:$0xff]  ;;  %2331 = vmatprep.subr.mxu0 %v1307_v31  ;;  %v1290_v4 = vld [vmem:[#allocation2 + $0x570] sm:$0xff]  ;;  %v1273_v9 = vld [vmem:[#allocation2 + $0x4e8] sm:$0xff] }
 0x49e   :  { %2031 = vmatprep.subr.mxu1 %v1291_v29  ;;  %v1274_v6 = vld [vmem:[#allocation2 + $0x4f0] sm:$0xff] }
 0x49f   :  { %v1097_v15 = vadd.f32 %v1096_v11, %v1095_v7  ;;  %v2891_v17 = vadd.f32 %v2295_v26, %v1993_v14  ;;  %v1089_v18 = vrot.slane %v1088_v10, 2  ;;  %2032 = vmatpush3.msra.mxu1 %v1275_v30  ;;  %v1306_v7 = vld [vmem:[#allocation2 + $0x5f0] sm:$0xff]  ;;  %v1288_v11 = vld [vmem:[#allocation2 + $0x560] sm:$0xff] }
 0x4a0   :  { %2033 = vmatprep.subr.mxu1 %v1290_v4  ;;  %v1272_v14 = vld [vmem:[#allocation2 + $0x4e0] sm:$0xff]  ;;  %v1278_v29 = vld [vmem:[#allocation2 + $0x510] sm:$0xff]  ;;  %v1277_v4 = vld [vmem:[#allocation2 + $0x508] sm:$0xff] }
 0x4a1   :  { %v1098_v19 = vrot.slane %v1097_v15, 2  ;;  %v1102_v16 = vadd.f32 %v2891_v17, %v2889_v12  ;;  %v1110_v33 = vmul.f32 %v2891_v17, %v2891_v17  ;;  %v1090_v13 = vadd.f32 %v1089_v18, %v1088_v10  ;;  %2034 = vmatpush3.msra.mxu1 %v1274_v6  ;;  %v1305_v10 = vld [vmem:[#allocation2 + $0x5e8] sm:$0xff]  ;;  %v1287_v18 = vld [vmem:[#allocation2 + $0x558] sm:$0xff]  ;;  %v1262_v30 = vld [vmem:[#allocation2 + $0x490] sm:$0xff] }
 0x4a2   :  { %2035 = vmatprep.subr.mxu1 %v1289_v8  ;;  %v1261_v6 = vld [vmem:[#allocation2 + $0x488] sm:$0xff]  ;;  %v1276_v8 = vld [vmem:[#allocation2 + $0x500] sm:$0xff] }
 0x4a3   :  { %v1099_v44 = vadd.f32 %v1098_v19, %v1097_v15  ;;  %v1103_v50 = vrot.slane %v1102_v16, 4  ;;  %v1111_v34 = vadd.f32 %v1110_v33, %v1109_v20  ;;  %v1091_v49 = vrot.slane %v1090_v13, 1  ;;  %2036 = vmatpush3.msra.mxu1 %v1273_v9  ;;  %v1304_v15 = vld [vmem:[#allocation2 + $0x5e0] sm:$0xff]  ;;  %v1271_v19 = vld [vmem:[#allocation2 + $0x4d8] sm:$0xff]  ;;  %v1270_v33 = vld [vmem:[#allocation2 + $0x4d0] sm:$0xff] }
 0x4a4   :  { %2037 = vmatprep.subr.mxu1 %v1288_v11  ;;  %v1303_v20 = vld [vmem:[#allocation2 + $0x5d8] sm:$0xff]  ;;  %v1260_v9 = vld [vmem:[#allocation2 + $0x480] sm:$0xff] }
 0x4a5   :  { %v1104_v36 = vadd.f32 %v1103_v50, %v1102_v16  ;;  %v1112_v38 = vrot.slane %v1111_v34, 4  ;;  %v1100_v39 = vrot.slane %v1099_v44, 1  ;;  %v1092_v22 = vadd.f32 %v1091_v49, %v1090_v13  ;;  %2038 = vmatpush3.msra.mxu1 %v1272_v14  ;;  %v1286_v16 = vld [vmem:[#allocation2 + $0x550] sm:$0xff]  ;;  %v1285_v50 = vld [vmem:[#allocation2 + $0x548] sm:$0xff]  ;;  %v1299_v49 = vld [vmem:[#allocation2 + $0x5b8] sm:$0xff] }
 0x4a6   :  { %2039 = vmatprep.subr.mxu1 %v1287_v18  ;;  %v1301_v13 = vld [vmem:[#allocation2 + $0x5c8] sm:$0xff] }
 0x4a7   :  { %v1105_v40 = vrot.slane %v1104_v36, 2  ;;  %v1113_v43 = vadd.f32 %v1112_v38, %v1111_v34  ;;  %v1101_v21 = vadd.f32 %v1100_v39, %v1099_v44  ;;  %2040 = vmatpush3.msra.mxu1 %v1271_v19  ;;  %v1302_v44 = vld [vmem:[#allocation2 + $0x5d0] sm:$0xff]  ;;  %v1269_v34 = vld [vmem:[#allocation2 + $0x4c8] sm:$0xff]  ;;  %v1268_v38 = vld [vmem:[#allocation2 + $0x4c0] sm:$0xff] }
 0x4a8   :  { %2041 = vmatprep.subr.mxu1 %v1286_v16  ;;  %v1300_v39 = vld [vmem:[#allocation2 + $0x5c0] sm:$0xff] }
 0x4a9   :  { %v1106_v2 = vadd.f32 %v1105_v40, %v1104_v36  ;;  %v1114_v3 = vrot.slane %v1113_v43, 2  ;;  %v1118_v35 = vsel %vm56_vm0, %v1092_v22, %v1101_v21  ;;  %2042 = vmatpush3.msra.mxu1 %v1270_v33  ;;  %v1284_v36 = vld [vmem:[#allocation2 + $0x540] sm:$0xff]  ;;  %v1283_v40 = vld [vmem:[#allocation2 + $0x538] sm:$0xff]  ;;  %v1298_v21 = vld [vmem:[#allocation2 + $0x5b0] sm:$0xff] }
 0x4aa   :  { %2043 = vmatprep.subr.mxu1 %v1285_v50  ;;  %v1297_v22 = vld [vmem:[#allocation2 + $0x5a8] sm:$0xff] }
 0x4ab   :  { %v1107_v32 = vrot.slane %v1106_v2, 1  ;;  %v1115_v45 = vadd.f32 %v1114_v3, %v1113_v43  ;;  %2044 = vmatpush3.msra.mxu1 %v1269_v34  ;;  %v1267_v43 = vld [vmem:[#allocation2 + $0x4b8] sm:$0xff]  ;;  %v1266_v3 = vld [vmem:[#allocation2 + $0x4b0] sm:$0xff] }
 0x4ac   :  { %2045 = vmatprep.subr.mxu1 %v1284_v36 }
 0x4ad   :  { %v1108_v41 = vadd.f32 %v1107_v32, %v1106_v2  ;;  %v1116_v24 = vrot.slane %v1115_v45, 1  ;;  %2046 = vmatpush3.msra.mxu1 %v1268_v38  ;;  %v1282_v2 = vld [vmem:[#allocation2 + $0x530] sm:$0xff]  ;;  %v1281_v32 = vld [vmem:[#allocation2 + $0x528] sm:$0xff] }
 0x4ae   :  { %2047 = vmatprep.subr.mxu1 %v1283_v40 }
 0x4af   :  { %v1117_v26 = vadd.f32 %v1116_v24, %v1115_v45  ;;  %v1119_v27 = vsel %vm337_vm3, %v1118_v35, %v1108_v41  ;;  %2048 = vmatpush3.msra.mxu1 %v1267_v43  ;;  %v1265_v45 = vld [vmem:[#allocation2 + $0x4a8] sm:$0xff]  ;;  %v1280_v41 = vld [vmem:[#allocation2 + $0x520] sm:$0xff] }
 0x4b0   :  { %2049 = vmatprep.subr.mxu1 %v1282_v2  ;;  %v1264_v24 = vld [vmem:[#allocation2 + $0x4a0] sm:$0xff] }
 0x4b1   :  { %v1120_v28 = vsel %vm339_vm4, %v1119_v27, %v1117_v26  ;;  %2050 = vmatpush3.msra.mxu1 %v1266_v3  ;;  %v1296_v35 = vld [vmem:[#allocation2 + $0x5a0] sm:$0xff]  ;;  %v1279_v26 = vld [vmem:[#allocation2 + $0x518] sm:$0xff] }
 0x4b2   :  { %2329 = vmatmul.mubr.f32.vlgmr.msra.gmra.mxu0 %v1120_v28  ;;  %2051 = vmatprep.subr.mxu1 %v1281_v32  ;;  %v1263_v27 = vld [vmem:[#allocation2 + $0x498] sm:$0xff] }
 0x4b3   :  { %2332 = vmatpush3.msra.mxu0 %v1307_v31  ;;  %2052 = vmatpush3.msra.mxu1 %v1265_v45  ;;  %v1295_v28 = vld [vmem:[#allocation2 + $0x598] sm:$0xff]  ;;  %v1294_v31 = vld [vmem:[#allocation2 + $0x590] sm:$0xff] }
 0x4b4   :  { %2333 = vmatprep.subr.mxu0 %v1306_v7  ;;  %2053 = vmatprep.subr.mxu1 %v1280_v41 }
 0x4b5   :  { %2334 = vmatpush3.msra.mxu0 %v1306_v7  ;;  %2054 = vmatpush3.msra.mxu1 %v1264_v24  ;;  %v1293_v7 = vld [vmem:[#allocation2 + $0x588] sm:$0xff] }
 0x4b6   :  { %2335 = vmatprep.subr.mxu0 %v1305_v10  ;;  %2055 = vmatprep.subr.mxu1 %v1279_v26 }
 0x4b7   :  { %2336 = vmatpush3.msra.mxu0 %v1305_v10  ;;  %2056 = vmatpush3.msra.mxu1 %v1263_v27  ;;  %v1292_v10 = vld [vmem:[#allocation2 + $0x580] sm:$0xff] }
 0x4b8   :  { %2337 = vmatprep.subr.mxu0 %v1304_v15  ;;  %2057 = vmatprep.subr.mxu1 %v1278_v29 }
 0x4b9   :  { %2338 = vmatpush3.msra.mxu0 %v1304_v15  ;;  %2058 = vmatpush3.msra.mxu1 %v1262_v30 }
 0x4ba   :  { %2339 = vmatprep.subr.mxu0 %v1303_v20  ;;  %2059 = vmatprep.subr.mxu1 %v1277_v4 }
 0x4bb   :  { %2340 = vmatpush3.msra.mxu0 %v1303_v20  ;;  %2060 = vmatpush3.msra.mxu1 %v1261_v6 }
 0x4bc   :  { %2341 = vmatprep.subr.mxu0 %v1302_v44  ;;  %2061 = vmatprep.subr.mxu1 %v1276_v8  ;;  %v1629_v8 = vld [vmem:[%s3214_s3 + $0x70] sm:$0xff] }
 0x4bd   :  { %2342 = vmatpush3.msra.mxu0 %v1302_v44  ;;  %2062 = vmatpush3.msra.mxu1 %v1260_v9  ;;  %v1628_v9 = vld [vmem:[%s3214_s3 + $0x68] sm:$0xff] }
 0x4be   :  { %2343 = vmatprep.subr.mxu0 %v1301_v13  ;;  %2369 = vmatprep.subr.mxu1 %v2462_v5 }
 0x4bf   :  { %2344 = vmatpush3.msra.mxu0 %v1301_v13 }
 0x4c0   :  { %2345 = vmatprep.subr.mxu0 %v1300_v39 }
 0x4c1   :  { %2346 = vmatpush3.msra.mxu0 %v1300_v39 }
 0x4c2   :  { %2347 = vmatprep.subr.mxu0 %v1299_v49 }
 0x4c3   :  { %2348 = vmatpush3.msra.mxu0 %v1299_v49 }
 0x4c4   :  { %2349 = vmatprep.subr.mxu0 %v1298_v21 }
 0x4c5   :  { %2350 = vmatpush3.msra.mxu0 %v1298_v21 }
 0x4c6   :  { %2351 = vmatprep.subr.mxu0 %v1297_v22 }
 0x4c7   :  { %2352 = vmatpush3.msra.mxu0 %v1297_v22 }
 0x4c8   :  { %2353 = vmatprep.subr.mxu0 %v1296_v35 }
 0x4c9   :  { %2354 = vmatpush3.msra.mxu0 %v1296_v35 }
 0x4ca   :  { %2355 = vmatprep.subr.mxu0 %v1295_v28 }
 0x4cb   :  { %2356 = vmatpush3.msra.mxu0 %v1295_v28 }
 0x4cc   :  { %2357 = vmatprep.subr.mxu0 %v1294_v31 }
 0x4cd   :  { %2358 = vmatpush3.msra.mxu0 %v1294_v31 }
 0x4ce   :  { %2359 = vmatprep.subr.mxu0 %v1293_v7 }
 0x4cf   :  { %2360 = vmatpush3.msra.mxu0 %v1293_v7  ;;  %v1630_v7 = vld [vmem:[%s3214_s3 + $0x78] sm:$0xff] }
 0x4d0   :  { %2361 = vmatprep.subr.mxu0 %v1292_v10 }
 0x4d1   :  { %2362 = vmatpush3.msra.mxu0 %v1292_v10  ;;  %v1627_v10 = vld [vmem:[%s3214_s3 + $0x60] sm:$0xff] }
 0x572   :  { %v1187_v11 = vpop.f32.mrf.mxu0 }
 0x573   :  { %v1191_v14 = vmul.f32 %v1187_v11, %v1187_v11  ;;  %v1200_v33 = vrot.slane %v1187_v11, %v2669_v47  ;;  %v1216_v44 = vrot.slane %v1187_v11, %v2671_v48 }
 0x574   :  { %v2330_v15 = vpop.f32.mrf.mxu0 }
 0x575   :  { %v1193_v18 = vrot.slane %v1191_v14, 7  ;;  %v1202_v34 = vsub.f32 %v2881_v25, %v1200_v33  ;;  %v1217_v13 = vsub.f32 %v2889_v12, %v1216_v44  ;;  %v1218_v36 = vsub.f32 %v2891_v17, %v1216_v44  ;;  %v1625_v14 = vld [vmem:[%s3214_s3 + $0x50] sm:$0xff]  ;;  %v1624_v15 = vld [vmem:[%s3214_s3 + $0x48] sm:$0xff]  ;;  %v1618_v44 = vld [vmem:[%s3214_s3 + $0x18] sm:$0xff] }
 0x576   :  { %v1201_v39 = vsub.f32 %v2879_v23, %v1200_v33  ;;  %v1619_v33 = vld [vmem:[%s3214_s3 + $0x20] sm:$0xff] }
 0x577   :  { %v1195_v19 = vsub.f32 %v1187_v11, %v1193_v18  ;;  %v1626_v11 = vld [vmem:[%s3214_s3 + $0x58] sm:$0xff]  ;;  %v1623_v18 = vld [vmem:[%s3214_s3 + $0x40] sm:$0xff] }
 0x579   :  { %v1196_v20 = vmax.f32 %v1195_v19, 0.0  ;;  %v1622_v19 = vld [vmem:[%s3214_s3 + $0x38] sm:$0xff] }
 0x57b   :  { %v1203_v16 = vadd.f32 1e-05, %v1196_v20  ;;  %v1621_v20 = vld [vmem:[%s3214_s3 + $0x30] sm:$0xff] }
 0x57d   :  { %2413 = vrsqrt.f32 %v1203_v16  ;;  %v1620_v16 = vld [vmem:[%s3214_s3 + $0x28] sm:$0xff] }
 0x58a   :  { %v2414_v50 = vpop.eup %2413 }
 0x58b   :  { %v1222_v38 = vrot.slane %v2414_v50, %v2675_v51  ;;  %v1208_v40 = vrot.slane %v2414_v50, %v2677_v52  ;;  %v1617_v50 = vld [vmem:[%s3214_s3 + $0x10] sm:$0xff] }
 0x58d   :  { %v1223_v43 = vmul.f32 %v1222_v38, %v1217_v13  ;;  %v1224_v49 = vmul.f32 %v1222_v38, %v1218_v36  ;;  %v1209_v2 = vmul.f32 %v1208_v40, %v1201_v39  ;;  %v1210_v3 = vmul.f32 %v1208_v40, %v1202_v34  ;;  %v1616_v34 = vld [vmem:[%s3214_s3 + $0x8] sm:$0xff]  ;;  %v1615_v13 = vld [vmem:[%s3214_s3] sm:$0xff]  ;;  %v1678_v36 = vld [vmem:[%s3214_s3 + $0x1f8] sm:$0xff] }
 0x58e   :  { %v1677_v38 = vld [vmem:[%s3214_s3 + $0x1f0] sm:$0xff] }
 0x58f   :  { %v1225_v21 = vmax.f32 %v1223_v43, 0.0  ;;  %v1226_v32 = vmax.f32 %v1224_v49, 0.0  ;;  %v1211_v45 = vmax.f32 %v1209_v2, 0.0  ;;  %v1212_v22 = vmax.f32 %v1210_v3, 0.0 }
 0x591   :  { %v1228_v41 = vrot.slane %v1211_v45, 1  ;;  %v1231_v25 = vrot.slane %v1211_v45, 7  ;;  %1372 = vmatprep.mubr.f32.mxu1 %v1211_v45  ;;  %v1237_v12 = vrot.slane %v1212_v22, 1  ;;  %v1232_v24 = vrot.slane %v1212_v22, 7 }
 0x592   :  { %v1244_v17 = vrot.slane %v1225_v21, 1  ;;  %v1253_v35 = vrot.slane %v1226_v32, 1  ;;  %v1248_v28 = vrot.slane %v1226_v32, 7  ;;  %v1247_v31 = vrot.slane %v1225_v21, 7 }
 0x593   :  { %v1236_v26 = vsel %vm56_vm0, %v1228_v41, %v1231_v25  ;;  %v1238_v23 = vsel %vm63_vm1, %v1228_v41, %v1237_v12  ;;  %v1242_v27 = vsel %vm63_vm1, %v1237_v12, %v1232_v24  ;;  %v1233_v30 = vsel %vm56_vm0, %v1231_v25, %v1232_v24 }
 0x594   :  { %1373 = vmatmul.mubr.f32.vlgmr.msra.gmra.mxu1 %v1236_v26  ;;  %2363 = vmatprep.mubr.f32.mxu0 %v1238_v23  ;;  %v1254_v29 = vsel %vm63_vm1, %v1244_v17, %v1253_v35  ;;  %v1258_v4 = vsel %vm63_vm1, %v1253_v35, %v1248_v28  ;;  %v1252_v6 = vsel %vm56_vm0, %v1244_v17, %v1247_v31 }
 0x595   :  { %1377 = vmatprep.mubr.f32.mxu1 %v1212_v22  ;;  %2364 = vmatmul.mubr.f32.vlgmr.msra.gmra.mxu0 %v1242_v27 }
 0x596   :  { %2366 = vmatprep.mubr.f32.mxu0 %v1254_v29  ;;  %2370 = vmatpush3.msra.mxu1 %v2765_v37  ;;  %v1249_v37 = vsel %vm56_vm0, %v1247_v31, %v1248_v28 }
 0x597   :  { %2371 = vmatprep.subr.mxu1 %v2462_v5 }
 0x598   :  { %1378 = vmatmul.mubr.f32.gmra.mxu1 %v1233_v30 }
 0x599   :  { %1382 = vmatprep.mubr.f32.mxu1 %v1225_v21  ;;  %2367 = vmatmul.mubr.f32.gmra.mxu0 %v1258_v4 }
 0x59a   :  { %2372 = vmatpush3.msra.mxu1 %v2774_v42  ;;  %v1646_v42 = vld [vmem:[%s3214_s3 + $0xf8] sm:$0xff] }
 0x59b   :  { %2373 = vmatprep.subr.mxu1 %v2462_v5  ;;  %1679 = vmatprep.subr.mxu0 %v1646_v42 }
 0x59c   :  { %1383 = vmatmul.mubr.f32.gmra.mxu1 %v1252_v6 }
 0x59d   :  { %1387 = vmatprep.mubr.f32.mxu1 %v1226_v32  ;;  %2374 = vmatpush3.msra.mxu1 %v2782_v46  ;;  %v1645_v46 = vld [vmem:[%s3214_s3 + $0xf0] sm:$0xff] }
 0x59e   :  { %2375 = vmatprep.subr.mxu1 %v2462_v5  ;;  %1680 = vmatpush1.msra.mxu0 %v1645_v46 }
 0x59f   :  { %2376 = vmatpush3.msra.mxu1 %v2790_v53  ;;  %v1644_v53 = vld [vmem:[%s3214_s3 + $0xe8] sm:$0xff] }
 0x5a0   :  { %1388 = vmatmul.mubr.f32.gmra.mxu1 %v1249_v37  ;;  %2377 = vmatprep.subr.mxu1 %v2462_v5 }
 0x5a1   :  { %2378 = vmatpush3.msra.mxu1 %v2797_v54  ;;  %2401 = vmatprep.mubr.msk.f32.mxu1 %vm2463_vm2, %v2462_v5  ;;  %v1643_v54 = vld [vmem:[%s3214_s3 + $0xe0] sm:$0xff] }
 0x5a2   :  { %2379 = vmatprep.subr.mxu1 %v2462_v5  ;;  %1681 = vmatprep.subr.mxu0 %v1644_v53 }
 0x5a3   :  { %2380 = vmatpush3.msra.mxu1 %v2806_v55  ;;  %v1641_v55 = vld [vmem:[%s3214_s3 + $0xd0] sm:$0xff]  ;;  %1682 = vmatpush1.msra.mxu0 %v1643_v54 }
 0x5a4   :  { %2381 = vmatprep.subr.mxu1 %v2462_v5 }
 0x5a5   :  { %2382 = vmatpush3.msra.mxu1 %v2813_v56  ;;  %v1640_v56 = vld [vmem:[%s3214_s3 + $0xc8] sm:$0xff] }
 0x5a6   :  { %2383 = vmatprep.subr.mxu1 %v2462_v5 }
 0x5a7   :  { %2384 = vmatpush3.msra.mxu1 %v2820_v57  ;;  %v1639_v57 = vld [vmem:[%s3214_s3 + $0xc0] sm:$0xff] }
 0x5a8   :  { %2385 = vmatprep.subr.mxu1 %v2462_v5 }
 0x5a9   :  { %2386 = vmatpush3.msra.mxu1 %v2827_v58  ;;  %v1638_v58 = vld [vmem:[%s3214_s3 + $0xb8] sm:$0xff] }
 0x5aa   :  { %2387 = vmatprep.subr.mxu1 %v2462_v5 }
 0x5ab   :  { %2388 = vmatpush3.msra.mxu1 %v2834_v59  ;;  %v1637_v59 = vld [vmem:[%s3214_s3 + $0xb0] sm:$0xff] }
 0x5ac   :  { %2389 = vmatprep.subr.mxu1 %v2462_v5 }
 0x5ad   :  { %2390 = vmatpush3.msra.mxu1 %v2841_v60  ;;  %v1636_v60 = vld [vmem:[%s3214_s3 + $0xa8] sm:$0xff] }
 0x5ae   :  { %2391 = vmatprep.subr.mxu1 %v2462_v5 }
 0x5af   :  { %2392 = vmatpush3.msra.mxu1 %v2848_v61  ;;  %v1635_v61 = vld [vmem:[%s3214_s3 + $0xa0] sm:$0xff] }
 0x5b0   :  { %2393 = vmatprep.subr.mxu1 %v2462_v5 }
 0x5b1   :  { %2394 = vmatpush3.msra.mxu1 %v2855_v62  ;;  %v1634_v62 = vld [vmem:[%s3214_s3 + $0x98] sm:$0xff] }
 0x5b2   :  { %2395 = vmatprep.subr.mxu1 %v2462_v5 }
 0x5b3   :  { %2396 = vmatpush3.msra.mxu1 %v2862_v63  ;;  %v1633_v63 = vld [vmem:[%s3214_s3 + $0x90] sm:$0xff] }
 0x5b4   :  { %2397 = vmatprep.subr.mxu1 %v2462_v5 }
 0x5b5   :  { %2398 = vmatpush3.msra.mxu1 %v2869_v0  ;;  %v1632_v0 = vld [vmem:[%s3214_s3 + $0x88] sm:$0xff] }
 0x5b6   :  { %2399 = vmatprep.subr.mxu1 %v2462_v5  ;;  %v1642_v5 = vld [vmem:[%s3214_s3 + $0xd8] sm:$0xff] }
 0x5b7   :  { %2400 = vmatpush3.msra.mxu1 %v2876_v1  ;;  %1683 = vmatprep.subr.mxu0 %v1642_v5  ;;  %v1631_v1 = vld [vmem:[%s3214_s3 + $0x80] sm:$0xff] }
 0x5b8   :  { %1684 = vmatpush1.msra.mxu0 %v1641_v55 }
 0x5b9   :  { %1685 = vmatprep.subr.mxu0 %v1640_v56 }
 0x5ba   :  { %1686 = vmatpush1.msra.mxu0 %v1639_v57 }
 0x5bb   :  { %1687 = vmatprep.subr.mxu0 %v1638_v58 }
 0x5bc   :  { %1688 = vmatpush1.msra.mxu0 %v1637_v59 }
 0x5bd   :  { %1689 = vmatprep.subr.mxu0 %v1636_v60 }
 0x5be   :  { %1690 = vmatpush1.msra.mxu0 %v1635_v61 }
 0x5bf   :  { %1691 = vmatprep.subr.mxu0 %v1634_v62 }
 0x5c0   :  { %1692 = vmatpush1.msra.mxu0 %v1633_v63 }
 0x5c1   :  { %1693 = vmatprep.subr.mxu0 %v1632_v0 }
 0x5c2   :  { %1694 = vmatpush1.msra.mxu0 %v1631_v1 }
 0x5c3   :  { %1695 = vmatprep.subr.mxu0 %v1630_v7 }
 0x5c4   :  { %1696 = vmatpush1.msra.mxu0 %v1629_v8 }
 0x5c5   :  { %1697 = vmatprep.subr.mxu0 %v1628_v9 }
 0x5c6   :  { %1698 = vmatpush1.msra.mxu0 %v1627_v10 }
 0x5c7   :  { %1699 = vmatprep.subr.mxu0 %v1626_v11 }
 0x5c8   :  { %1700 = vmatpush1.msra.mxu0 %v1625_v14 }
 0x5c9   :  { %1701 = vmatprep.subr.mxu0 %v1624_v15 }
 0x5ca   :  { %1702 = vmatpush1.msra.mxu0 %v1623_v18 }
 0x5cb   :  { %1703 = vmatprep.subr.mxu0 %v1622_v19 }
 0x5cc   :  { %1704 = vmatpush1.msra.mxu0 %v1621_v20 }
 0x5cd   :  { %1705 = vmatprep.subr.mxu0 %v1620_v16 }
 0x5ce   :  { %1706 = vmatpush1.msra.mxu0 %v1619_v33 }
 0x5cf   :  { %1707 = vmatprep.subr.mxu0 %v1618_v44 }
 0x5d0   :  { %1708 = vmatpush1.msra.mxu0 %v1617_v50  ;;  %v1676_v50 = vld [vmem:[%s3214_s3 + $0x1e8] sm:$0xff] }
 0x5d1   :  { %1709 = vmatprep.subr.mxu0 %v1616_v34  ;;  %v1675_v34 = vld [vmem:[%s3214_s3 + $0x1e0] sm:$0xff] }
 0x5d2   :  { %1710 = vmatpush1.msra.mxu0 %v1615_v13  ;;  %v1674_v13 = vld [vmem:[%s3214_s3 + $0x1d8] sm:$0xff] }
 0x5d3   :  { %1711 = vmatprep.subr.mxu0 %v1678_v36  ;;  %v1673_v36 = vld [vmem:[%s3214_s3 + $0x1d0] sm:$0xff] }
 0x5d4   :  { %1712 = vmatpush2.msra.mxu0 %v1677_v38  ;;  %v1672_v38 = vld [vmem:[%s3214_s3 + $0x1c8] sm:$0xff] }
 0x5d5   :  { %1713 = vmatprep.subr.mxu0 %v1676_v50 }
 0x5d6   :  { %1714 = vmatpush2.msra.mxu0 %v1675_v34 }
 0x5d7   :  { %1715 = vmatprep.subr.mxu0 %v1674_v13 }
 0x5d8   :  { %1716 = vmatpush2.msra.mxu0 %v1673_v36 }
 0x5d9   :  { %1717 = vmatprep.subr.mxu0 %v1672_v38 }
 0x654   :  { %v2063_v39 = vpop.f32.mrf.mxu1 }
 0x655   :  { %v2365_v40 = vpop.f32.mrf.mxu0 }
 0x656   :  { %v2064_v43 = vpop.f32.mrf.mxu1 }
 0x657   :  { %v2065_v49 = vadd.f32 %v2064_v43, %v2063_v39  ;;  %v1459_v2 = vpop.f32.mrf.mxu0  ;;  %v1671_v39 = vld [vmem:[%s3214_s3 + $0x1c0] sm:$0xff]  ;;  %v1669_v43 = vld [vmem:[%s3214_s3 + $0x1b0] sm:$0xff] }
 0x658   :  { %v2066_v3 = vpop.f32.mrf.mxu1  ;;  %1718 = vmatpush2.msra.mxu0 %v1671_v39 }
 0x659   :  { %v3054_v32 = vadd.f32 %v2065_v49, %v1459_v2  ;;  %v2368_v25 = vpop.f32.mrf.mxu0  ;;  %v1668_v49 = vld [vmem:[%s3214_s3 + $0x1a8] sm:$0xff]  ;;  %v1667_v2 = vld [vmem:[%s3214_s3 + $0x1a0] sm:$0xff] }
 0x65a   :  { %v2067_v21 = vpop.f32.mrf.mxu1 }
 0x65b   :  { %v2068_v45 = vadd.f32 %v2067_v21, %v2066_v3  ;;  %v1485_v24 = vmul.f32 %v3054_v32, %v3054_v32  ;;  %v1469_v29 = vpop.f32.mrf.mxu0  ;;  %v1666_v3 = vld [vmem:[%s3214_s3 + $0x198] sm:$0xff]  ;;  %v1665_v21 = vld [vmem:[%s3214_s3 + $0x190] sm:$0xff] }
 0x65c   :  { %v2069_v22 = vpop.f32.mrf.mxu1 }
 0x65d   :  { %v3056_v41 = vadd.f32 %v2365_v40, %v2068_v45  ;;  %v1670_v40 = vld [vmem:[%s3214_s3 + $0x1b8] sm:$0xff]  ;;  %v1664_v45 = vld [vmem:[%s3214_s3 + $0x188] sm:$0xff] }
 0x65e   :  { %v2070_v12 = vpop.f32.mrf.mxu1  ;;  %1719 = vmatprep.subr.mxu0 %v1670_v40 }
 0x65f   :  { %v1478_v17 = vadd.f32 %v3056_v41, %v3054_v32  ;;  %v1486_v35 = vmul.f32 %v3056_v41, %v3056_v41  ;;  %v2071_v26 = vadd.f32 %v2070_v12, %v2069_v22  ;;  %1720 = vmatpush2.msra.mxu0 %v1669_v43  ;;  %v1663_v22 = vld [vmem:[%s3214_s3 + $0x180] sm:$0xff]  ;;  %v1661_v12 = vld [vmem:[%s3214_s3 + $0x170] sm:$0xff] }
 0x660   :  { %v2072_v23 = vpop.f32.mrf.mxu1  ;;  %1721 = vmatprep.subr.mxu0 %v1668_v49 }
 0x661   :  { %v1479_v27 = vrot.slane %v1478_v17, 4  ;;  %v1487_v28 = vadd.f32 %v1486_v35, %v1485_v24  ;;  %v3064_v6 = vadd.f32 %v2071_v26, %v1469_v29  ;;  %1722 = vmatpush2.msra.mxu0 %v1667_v2  ;;  %v1660_v24 = vld [vmem:[%s3214_s3 + $0x168] sm:$0xff]  ;;  %v1658_v35 = vld [vmem:[%s3214_s3 + $0x158] sm:$0xff]  ;;  %v1657_v26 = vld [vmem:[%s3214_s3 + $0x150] sm:$0xff] }
 0x662   :  { %v2073_v30 = vpop.f32.mrf.mxu1  ;;  %1723 = vmatprep.subr.mxu0 %v1666_v3  ;;  %v1653_v29 = vld [vmem:[%s3214_s3 + $0x130] sm:$0xff] }
 0x663   :  { %v1480_v31 = vadd.f32 %v1479_v27, %v1478_v17  ;;  %v1488_v4 = vrot.slane %v1487_v28, 4  ;;  %v2074_v37 = vadd.f32 %v2073_v30, %v2072_v23  ;;  %v1501_v5 = vmul.f32 %v3064_v6, %v3064_v6  ;;  %1724 = vmatpush2.msra.mxu0 %v1665_v21  ;;  %v1659_v17 = vld [vmem:[%s3214_s3 + $0x160] sm:$0xff]  ;;  %v1656_v23 = vld [vmem:[%s3214_s3 + $0x148] sm:$0xff] }
 0x664   :  { %1725 = vmatprep.subr.mxu0 %v1664_v45  ;;  %v1655_v27 = vld [vmem:[%s3214_s3 + $0x140] sm:$0xff]  ;;  %v1652_v30 = vld [vmem:[%s3214_s3 + $0x128] sm:$0xff] }
 0x665   :  { %v1489_v42 = vadd.f32 %v1488_v4, %v1487_v28  ;;  %v3066_v46 = vadd.f32 %v2368_v25, %v2074_v37  ;;  %v1481_v53 = vrot.slane %v1480_v31, 2  ;;  %v1662_v25 = vld [vmem:[%s3214_s3 + $0x178] sm:$0xff]  ;;  %1726 = vmatpush2.msra.mxu0 %v1663_v22  ;;  %v1649_v37 = vld [vmem:[%s3214_s3 + $0x110] sm:$0xff] }
 0x666   :  { %1727 = vmatprep.subr.mxu0 %v1662_v25  ;;  %v1654_v28 = vld [vmem:[%s3214_s3 + $0x138] sm:$0xff] }
 0x667   :  { %v1490_v54 = vrot.slane %v1489_v42, 2  ;;  %v1494_v55 = vadd.f32 %v3066_v46, %v3064_v6  ;;  %v1502_v56 = vmul.f32 %v3066_v46, %v3066_v46  ;;  %v1482_v60 = vadd.f32 %v1481_v53, %v1480_v31  ;;  %1728 = vmatpush2.msra.mxu0 %v1661_v12  ;;  %v1651_v31 = vld [vmem:[%s3214_s3 + $0x120] sm:$0xff]  ;;  %v1650_v4 = vld [vmem:[%s3214_s3 + $0x118] sm:$0xff] }
 0x668   :  { %1729 = vmatprep.subr.mxu0 %v1660_v24  ;;  %v1647_v53 = vld [vmem:[%s3214_s3 + $0x100] sm:$0xff] }
 0x669   :  { %v1491_v57 = vadd.f32 %v1490_v54, %v1489_v42  ;;  %v1495_v58 = vrot.slane %v1494_v55, 4  ;;  %v1503_v59 = vadd.f32 %v1502_v56, %v1501_v5  ;;  %v1483_v7 = vrot.slane %v1482_v60, 1  ;;  %1730 = vmatpush2.msra.mxu0 %v1659_v17  ;;  %v1648_v42 = vld [vmem:[%s3214_s3 + $0x108] sm:$0xff] }
 0x66a   :  { %1731 = vmatprep.subr.mxu0 %v1658_v35 }
 0x66b   :  { %v1496_v61 = vadd.f32 %v1495_v58, %v1494_v55  ;;  %v1504_v62 = vrot.slane %v1503_v59, 4  ;;  %v1492_v63 = vrot.slane %v1491_v57, 1  ;;  %v1484_v15 = vadd.f32 %v1483_v7, %v1482_v60  ;;  %1732 = vmatpush2.msra.mxu0 %v1657_v26 }
 0x66c   :  { %1733 = vmatprep.subr.mxu0 %v1656_v23 }
 0x66d   :  { %v1497_v0 = vrot.slane %v1496_v61, 2  ;;  %v1505_v1 = vadd.f32 %v1504_v62, %v1503_v59  ;;  %v1493_v10 = vadd.f32 %v1492_v63, %v1491_v57  ;;  %1734 = vmatpush2.msra.mxu0 %v1655_v27 }
 0x66e   :  { %1735 = vmatprep.subr.mxu0 %v1654_v28 }
 0x66f   :  { %v1498_v8 = vadd.f32 %v1497_v0, %v1496_v61  ;;  %v1506_v9 = vrot.slane %v1505_v1, 2  ;;  %v1510_v20 = vsel %vm56_vm0, %v1484_v15, %v1493_v10  ;;  %1736 = vmatpush2.msra.mxu0 %v1653_v29  ;;  %v2433_v10 = vld [vmem:[%s3211_s0] sm:$0xff] }
 0x670   :  { %1737 = vmatprep.subr.mxu0 %v1652_v30 }
 0x671   :  { %v1499_v11 = vrot.slane %v1498_v8, 1  ;;  %v1507_v14 = vadd.f32 %v1506_v9, %v1505_v1  ;;  %1738 = vmatpush2.msra.mxu0 %v1651_v31 }
 0x672   :  { %1739 = vmatprep.subr.mxu0 %v1650_v4 }
 0x673   :  { %v1500_v18 = vadd.f32 %v1499_v11, %v1498_v8  ;;  %v1508_v19 = vrot.slane %v1507_v14, 1  ;;  %1740 = vmatpush2.msra.mxu0 %v1649_v37 }
 0x674   :  { %1741 = vmatprep.subr.mxu0 %v1648_v42 }
 0x675   :  { %v1509_v16 = vadd.f32 %v1508_v19, %v1507_v14  ;;  %v1511_v33 = vsel %vm337_vm3, %v1510_v20, %v1500_v18  ;;  %1742 = vmatpush2.msra.mxu0 %v1647_v53 }
 0x677   :  { %v1512_v44 = vsel %vm339_vm4, %v1511_v33, %v1509_v16 }
 0x678   :  { %2402 = vmatmul.mubr.f32.vlgmr.msra.gmra.mxu1 %v1512_v44 }
 0x738   :  { %v1579_v54 = vpop.f32.mrf.mxu1 }
 0x739   :  { %v1583_v5 = vmul.f32 %v1579_v54, %v1579_v54  ;;  %v1592_v60 = vrot.slane %v1579_v54, %v2669_v47  ;;  %v1606_v0 = vrot.slane %v1579_v54, %v2671_v48  ;;  %v2434_v48 = vld [vmem:[%s3211_s0 + $0x8] sm:$0xff] }
 0x73a   :  { %v2403_v55 = vpop.f32.mrf.mxu1 }
 0x73b   :  { %v1585_v56 = vrot.slane %v1583_v5, 7  ;;  %v1593_v62 = vsub.f32 %v3054_v32, %v1592_v60  ;;  %v1594_v7 = vsub.f32 %v3056_v41, %v1592_v60  ;;  %v1607_v47 = vsub.f32 %v3064_v6, %v1606_v0  ;;  %v2436_v6 = vld [vmem:[%s3211_s0 + $0x18] sm:$0xff] }
 0x73d   :  { %v1587_v57 = vsub.f32 %v1579_v54, %v1585_v56 }
 0x73f   :  { %v1588_v58 = vmax.f32 %v1587_v57, 0.0 }
 0x741   :  { %v1595_v59 = vadd.f32 1e-05, %v1588_v58 }
 0x743   :  { %2415 = vrsqrt.f32 %v1595_v59 }
 0x750   :  { %v2416_v61 = vpop.eup %2415 }
 0x751   :  { %v1600_v63 = vrot.slane %v2416_v61, %v2677_v52  ;;  %v1612_v9 = vrot.slane %v2416_v61, %v2675_v51  ;;  %v1608_v52 = vsub.f32 %v3066_v46, %v1606_v0  ;;  %v2435_v51 = vld [vmem:[%s3211_s0 + $0x10] sm:$0xff] }
 0x753   :  { %v1601_v1 = vmul.f32 %v1600_v63, %v1593_v62  ;;  %v1602_v8 = vmul.f32 %v1600_v63, %v1594_v7  ;;  %v1613_v32 = vmul.f32 %v1612_v9, %v1607_v47  ;;  %v1614_v41 = vmul.f32 %v1612_v9, %v1608_v52 }
 0x755   :  { %1743 = vmatprep.mubr.f32.mxu0 %v1601_v1 }
 0x756   :  { %1744 = vmatmul.mubr.f32.vlgmr.msra.gmra.mxu0 %v2433_v10 }
 0x757   :  { %1749 = vmatprep.mubr.f32.mxu0 %v1602_v8 }
 0x75a   :  { %1750 = vmatmul.mubr.f32.gmra.mxu0 %v2434_v48 }
 0x75b   :  { %1755 = vmatprep.mubr.f32.mxu0 %v1613_v32 }
 0x75e   :  { %1756 = vmatmul.mubr.f32.gmra.mxu0 %v2435_v51 }
 0x75f   :  { %1761 = vmatprep.mubr.f32.mxu0 %v1614_v41 }
 0x762   :  { %1762 = vmatmul.mubr.f32.gmra.mxu0 %v2436_v6 }
 0x816   :  { %v1745_v11 = vpop.f32.mrf.mxu0 }
 0x817   :  { %1768 = vst [vmem:[%s3215_s4] sm:$0xff] %v1745_v11 }
 0x818   :  { %v1747_v14 = vpop.f32.mrf.mxu0 }
 0x819   :  { %1769 = vst [vmem:[%s3215_s4 + $0x8] sm:$0xff] %v1747_v14 }
 0x81a   :  { %v1751_v46 = vpop.f32.mrf.mxu0 }
 0x81b   :  { %1770 = vst [vmem:[%s3215_s4 + $0x10] sm:$0xff] %v1751_v46 }
 0x81c   :  { %v1753_v15 = vpop.f32.mrf.mxu0 }
 0x81d   :  { %1771 = vst [vmem:[%s3215_s4 + $0x18] sm:$0xff] %v1753_v15 }
 0x81e   :  { %v1757_v18 = vpop.f32.mrf.mxu0 }
 0x81f   :  { %1784 = vst [vmem:[%s3215_s4 + $0x20] sm:$0xff] %v1757_v18 }
 0x820   :  { %v1759_v19 = vpop.f32.mrf.mxu0 }
 0x821   :  { %1785 = vst [vmem:[%s3215_s4 + $0x28] sm:$0xff] %v1759_v19 }
 0x822   :  { %v1763_v20 = vpop.f32.mrf.mxu0 }
 0x823   :  { %1786 = vst [vmem:[%s3215_s4 + $0x30] sm:$0xff] %v1763_v20 }
 0x824   :  { %v1765_v16 = vpop.f32.mrf.mxu0 }
 0x825   :  { %1787 = vst [vmem:[%s3215_s4 + $0x38] sm:$0xff] %v1765_v16 }
 0x826   :  { %1781 = vsyncpa [#allocation3], 1 }

</bundles_post_ra>
